<compile_context>
chip_gen: v6e
topology: v6e:2x2x1
jax: 0.10.0
libtpu: 0.0.40
codegen_flags: <defaults>
</compile_context>

<pallas_src>
import math
import numpy as np

import jax
import jax.numpy as jnp
from jax.experimental import pallas as pl
from jax.experimental.pallas import tpu as pltpu

# ----------------------------- model config ---------------------------------
D_MODEL = 32
N_HEADS = 4
D_K = 8
D_V = 8
MAX_LEN = 64
EPS_LN = 1e-6
SCALE = math.sqrt(D_MODEL)

B = 2
S = 8


# ----------------------------- fused Pallas kernel --------------------------
def fused_rel_mha_kernel(x_ref, pe_ref, gamma_ref, beta_ref, mask_ref,
                         wqkv_ref, bqkv_ref, wpos_ref,
                         two_u_ref, upv_ref, wout_ref, bout_ref,
                         out_ref, atten_ref):
    S_ = x_ref.shape[1]
    D = x_ref.shape[2]
    H, dk, dv = N_HEADS, D_K, D_V

    xv = x_ref[0]                                            # (S, D)

    # ---- LayerNorm (torch-style: unbiased std, (x-mean)/(std+eps)) ----
    mean = jnp.mean(xv, axis=-1, keepdims=True)
    var = jnp.sum((xv - mean) ** 2, axis=-1, keepdims=True) / (D - 1)
    x_ln = gamma_ref[...] * ((xv - mean) / (jnp.sqrt(var) + EPS_LN)) + beta_ref[...]

    # ---- fused Q/K/V projection: (S, D) @ (D, 3*H*dk) ----
    qkv = jnp.dot(x_ln, wqkv_ref[...],
                  preferred_element_type=jnp.float32) + bqkv_ref[...]
    # ---- positional projection (no bias), from (S, D) PE table ----
    pos = jnp.dot(pe_ref[...], wpos_ref[...],
                  preferred_element_type=jnp.float32)        # (S, H*dk)

    q_all = qkv[:, :H * dk]
    k_all = qkv[:, H * dk:2 * H * dk]
    v_all = qkv[:, 2 * H * dk:]
    qc_all = q_all + two_u_ref[...]       # q + 2u  (reference adds u twice)
    qp_all = q_all + upv_ref[...]         # q + u + v

    mask = mask_ref[0]                    # (S, S) int32

    # ---- constants for the in-kernel relative shift (pad/reshape trick) ----
    # final[r,c] = pos_raw[r, c+S-1-r]        if c <= r
    #            = 0                          if c == r+1
    #            = pos_raw[r+1, c-r-2]        if c >  r+1
    r_idx = jax.lax.broadcasted_iota(jnp.int32, (S_, S_), 0)
    c_idx = jax.lax.broadcasted_iota(jnp.int32, (S_, S_), 1)
    rel1 = c_idx + (S_ - 1) - r_idx       # in [0, S) only where c <= r
    rel3 = c_idx - r_idx - 2              # in [0, S) only where c >= r+2
    m1 = [(rel1 == j).astype(jnp.float32) for j in range(S_)]
    m3 = [(rel3 == j).astype(jnp.float32) for j in range(S_)]
    shift_up = (c_idx == r_idx + 1).astype(jnp.float32)      # row r -> row r+1

    inv_scale = jnp.float32(1.0 / SCALE)
    neg_big = jnp.float32(-1e9)

    out_acc = jnp.zeros((S_, D), jnp.float32)
    for h in range(H):                    # static unroll over heads
        sl = slice(h * dk, (h + 1) * dk)
        qc = qc_all[:, sl]
        qp = qp_all[:, sl]
        k_h = k_all[:, sl]
        v_h = v_all[:, h * dv:(h + 1) * dv]
        p_h = pos[:, sl]

        content = jax.lax.dot_general(
            qc, k_h, (((1,), (1,)), ((), ())),
            preferred_element_type=jnp.float32)              # (S, S)
        pos_raw = jax.lax.dot_general(
            qp, p_h, (((1,), (1,)), ((), ())),
            preferred_element_type=jnp.float32)              # (S, S)
        pos_next = jnp.dot(shift_up, pos_raw,
                           preferred_element_type=jnp.float32)   # rows shifted up

        # relative shift, built from masked column-broadcast sums (exact)
        pos_shift = jnp.zeros((S_, S_), jnp.float32)
        for j in range(S_):
            pos_shift = (pos_shift
                         + pos_raw[:, j:j + 1] * m1[j]
                         + pos_next[:, j:j + 1] * m3[j])

        score = (content + pos_shift) * inv_scale
        score = jnp.where(mask != 0, neg_big, score)
        mx = jnp.max(score, axis=-1, keepdims=True)
        e = jnp.exp(score - mx)
        a = e * pl.reciprocal(jnp.sum(e, axis=-1, keepdims=True), approx=True)
        atten_ref[0, h] = a

        ctx_h = jnp.dot(a, v_h, preferred_element_type=jnp.float32)   # (S, dv)
        # folded output projection, accumulated per head (avoids lane concat)
        out_acc = out_acc + jnp.dot(ctx_h, wout_ref[h * dv:(h + 1) * dv, :],
                                    preferred_element_type=jnp.float32)

    out_ref[0] = out_acc + bout_ref[...] + xv                # + residual


# ------------------------- parameter preparation (host, once) ---------------
def make_positional_encoding(max_len, d_model):
    pe = np.zeros((max_len, d_model), dtype=np.float32)
    position = np.arange(0, max_len, dtype=np.float32)[:, None]
    div_term = np.exp(np.arange(0, d_model, 2).astype(np.float32)
                      * -(math.log(10000.0) / d_model))
    pe[:, 0::2] = np.sin(position * div_term)
    pe[:, 1::2] = np.cos(position * div_term)
    return jnp.asarray(pe)


def init_params(key):
    def xavier_normal(k, out_f, in_f):
        std = math.sqrt(2.0 / (in_f + out_f))
        return std * jax.random.normal(k, (out_f, in_f), jnp.float32)

    def xavier_uniform(k, shape):
        bound = math.sqrt(6.0 / (shape[0] + shape[1]))
        return jax.random.uniform(k, shape, jnp.float32, -bound, bound)

    ks = jax.random.split(key, 8)
    return {
        "Wq": xavier_normal(ks[0], N_HEADS * D_K, D_MODEL),
        "bq": jnp.zeros((N_HEADS * D_K,), jnp.float32),
        "Wk": xavier_normal(ks[1], N_HEADS * D_K, D_MODEL),
        "bk": jnp.zeros((N_HEADS * D_K,), jnp.float32),
        "Wv": xavier_normal(ks[2], N_HEADS * D_V, D_MODEL),
        "bv": jnp.zeros((N_HEADS * D_V,), jnp.float32),
        "Wpos": xavier_normal(ks[3], D_MODEL, D_MODEL),      # pos_proj: no bias
        "u_bias": xavier_uniform(ks[4], (N_HEADS, D_K)),
        "v_bias": xavier_uniform(ks[5], (N_HEADS, D_K)),
        "Wout": xavier_normal(ks[6], D_MODEL, D_MODEL),
        "bout": jnp.zeros((D_MODEL,), jnp.float32),
        "Wlin": xavier_normal(ks[7], D_MODEL, N_HEADS * D_V),
        "blin": jnp.zeros((D_MODEL,), jnp.float32),
        "gamma": jnp.ones((D_MODEL,), jnp.float32),
        "beta": jnp.zeros((D_MODEL,), jnp.float32),
        "pe": make_positional_encoding(MAX_LEN, D_MODEL),
    }


def prepare_params(P):
    """One-time host-side weight fusion / transposition (exact algebra)."""
    wqkv = jnp.concatenate([P["Wq"], P["Wk"], P["Wv"]], axis=0)     # (3*H*dk, D)
    wcomb = P["Wlin"] @ P["Wout"]        # out = ctx @ (Wlin@Wout)^T + (Wlin@bout + blin)
    return {
        "wqkv_t": wqkv.T,                                            # (D, 3*H*dk)
        "bqkv": jnp.concatenate([P["bq"], P["bk"], P["bv"]]).reshape(1, -1),
        "wpos_t": P["Wpos"].T,                                       # (D, H*dk)
        "two_u": (2.0 * P["u_bias"]).reshape(1, -1),                 # (1, H*dk)
        "u_plus_v": (P["u_bias"] + P["v_bias"]).reshape(1, -1),      # (1, H*dk)
        "wout_t": wcomb.T,                                           # (H*dv, D)
        "bout": (P["Wlin"] @ P["bout"] + P["blin"]).reshape(1, -1),  # (1, D)
        "gamma": P["gamma"].reshape(1, -1),
        "beta": P["beta"].reshape(1, -1),
        "pe": P["pe"],                                               # (MAX_LEN, D)
    }


# ------------------------- layer forward (single fused pallas_call) ---------
def rel_mha_layer_forward(x, atten_mask_bool, prep):
    Bx, Sx, D = x.shape
    H = N_HEADS
    mask_i32 = atten_mask_bool.astype(jnp.int32)

    out, atten = pl.pallas_call(
        fused_rel_mha_kernel,
        out_shape=(jax.ShapeDtypeStruct((Bx, Sx, D), jnp.float32),
                   jax.ShapeDtypeStruct((Bx, H, Sx, Sx), jnp.float32)),
        grid=(Bx,),
        in_specs=[
            pl.BlockSpec((1, Sx, D), lambda b: (b, 0, 0)),           # x
            pl.BlockSpec((Sx, D), lambda b: (0, 0)),                 # pe[:S]
            pl.BlockSpec((1, D), lambda b: (0, 0)),                  # gamma
            pl.BlockSpec((1, D), lambda b: (0, 0)),                  # beta
            pl.BlockSpec((1, Sx, Sx), lambda b: (b, 0, 0)),          # mask
            pl.BlockSpec((D, 3 * H * D_K), lambda b: (0, 0)),        # Wqkv^T
            pl.BlockSpec((1, 3 * H * D_K), lambda b: (0, 0)),        # bqkv
            pl.BlockSpec((D, H * D_K), lambda b: (0, 0)),            # Wpos^T
            pl.BlockSpec((1, H * D_K), lambda b: (0, 0)),            # 2*u
            pl.BlockSpec((1, H * D_K), lambda b: (0, 0)),            # u+v
            pl.BlockSpec((H * D_V, D), lambda b: (0, 0)),            # (Wlin@Wout)^T
            pl.BlockSpec((1, D), lambda b: (0, 0)),                  # folded bias
        ],
        out_specs=(
            pl.BlockSpec((1, Sx, D), lambda b: (b, 0, 0)),
            pl.BlockSpec((1, H, Sx, Sx), lambda b: (b, 0, 0, 0)),
        ),
        compiler_params=pltpu.CompilerParams(
            dimension_semantics=("parallel",)),
    )(x, prep["pe"], prep["gamma"], prep["beta"], mask_i32,
      prep["wqkv_t"], prep["bqkv"], prep["wpos_t"],
      prep["two_u"], prep["u_plus_v"], prep["wout_t"], prep["bout"])
    return out, atten


# ------------------------- pure-JAX reference (for checking) -----------------
def relative_shift(pos_score):
    Bx, H, S1, S2 = pos_score.shape
    zeros = jnp.zeros((Bx, H, S1, 1), pos_score.dtype)
    padded = jnp.concatenate([zeros, pos_score], axis=-1)
    padded = padded.reshape(Bx, H, S2 + 1, S1)
    return padded[:, :, 1:].reshape(Bx, H, S1, S2)


def rel_mha_layer_reference(x, atten_mask_bool, P):
    Bx, Sx, D = x.shape
    H, dk, dv = N_HEADS, D_K, D_V
    pos_emb = jnp.broadcast_to(P["pe"][:Sx][None], (Bx, Sx, D))
    residual = x

    mean = x.mean(-1, keepdims=True)
    std = jnp.sqrt(jnp.sum((x - mean) ** 2, -1, keepdims=True) / (D - 1))
    x_ln = P["gamma"] * ((x - mean) / (std + EPS_LN)) + P["beta"]

    lin = lambda z, W, b: z @ W.T + b
    q_ = lin(x_ln, P["Wq"], P["bq"]).reshape(Bx, Sx, H, dk)
    k_ = lin(x_ln, P["Wk"], P["bk"]).reshape(Bx, Sx, H, dk).transpose(0, 2, 1, 3)
    v_ = lin(x_ln, P["Wv"], P["bv"]).reshape(Bx, Sx, H, dv).transpose(0, 2, 1, 3)
    pos = (pos_emb @ P["Wpos"].T).reshape(Bx, Sx, H, dk)

    q_ = q_ + P["u_bias"]
    content = jnp.einsum("bshd,bhtd->bhst", q_ + P["u_bias"], k_)
    pos_score = jnp.einsum("bshd,bthd->bhst", q_ + P["v_bias"], pos)
    pos_score = relative_shift(pos_score)

    score = (content + pos_score) / SCALE
    score = jnp.where(atten_mask_bool[:, None], -1e9, score)
    atten = jax.nn.softmax(score, axis=-1)
    context = jnp.einsum("bhst,bhtd->bhsd", atten, v_)
    context = context.transpose(0, 2, 1, 3).reshape(Bx, Sx, D)
    context = context @ P["Wout"].T + P["bout"]
    output = context @ P["Wlin"].T + P["blin"]
    return output + residual, atten


# ----------------------------------- main ------------------------------------
if __name__ == "__main__":
    key = jax.random.PRNGKey(0)
    k_param, k_x = jax.random.split(key)
    P = init_params(k_param)
    prep = prepare_params(P)

    x = jax.random.normal(k_x, (B, S, D_MODEL), jnp.float32)

    # padding mask: key positions >= length are masked (True = masked)
    lengths = jnp.array([S, S - 2])
    atten_mask = jnp.broadcast_to(
        jnp.arange(S)[None, None, :] >= lengths[:, None, None], (B, S, S))

    out, atten = rel_mha_layer_forward(x, atten_mask, prep)
    out = jax.block_until_ready(out)
    atten = jax.block_until_ready(atten)

    ref_out, ref_atten = rel_mha_layer_reference(x, atten_mask, P)
    assert out.shape == (B, S, D_MODEL)
    assert atten.shape == (B, N_HEADS, S, S)
    np.testing.assert_allclose(np.asarray(out), np.asarray(ref_out),
                               rtol=2e-2, atol=2e-2)
    np.testing.assert_allclose(np.asarray(atten), np.asarray(ref_atten),
                               rtol=2e-2, atol=2e-2)

    print("KERNEL_OK")
</pallas_src>

<mosaic_0001>
module attributes {stable_mosaic.version = 11 : i64} {
  func.func @fused_rel_mha_kernel(%arg0: i32, %arg1: memref<1x8x32xf32, #tpu.memory_space<vmem>>, %arg2: memref<8x32xf32, #tpu.memory_space<vmem>>, %arg3: memref<1x32xf32, #tpu.memory_space<vmem>>, %arg4: memref<1x32xf32, #tpu.memory_space<vmem>>, %arg5: memref<1x8x8xi32, #tpu.memory_space<vmem>>, %arg6: memref<32x96xf32, #tpu.memory_space<vmem>>, %arg7: memref<1x96xf32, #tpu.memory_space<vmem>>, %arg8: memref<32x32xf32, #tpu.memory_space<vmem>>, %arg9: memref<1x32xf32, #tpu.memory_space<vmem>>, %arg10: memref<1x32xf32, #tpu.memory_space<vmem>>, %arg11: memref<32x32xf32, #tpu.memory_space<vmem>>, %arg12: memref<1x32xf32, #tpu.memory_space<vmem>>, %arg13: memref<1x8x32xf32, #tpu.memory_space<vmem>>, %arg14: memref<1x4x8x8xf32, #tpu.memory_space<vmem>>) attributes {dimension_semantics = [#tpu.dimension_semantics<parallel>], iteration_bounds = array<i64: 2>, scalar_prefetch = 0 : i64, scratch_operands = 0 : i64, tpu.core_type = #tpu.core_type<tc>, window_params = [{transform_indices = @transform_0, window_bounds = array<i64: 1, 8, 32>}, {transform_indices = @transform_1, window_bounds = array<i64: 8, 32>}, {pipeline_mode = #tpu.pipeline_mode<synchronous>, transform_indices = @transform_2, window_bounds = array<i64: 1, 32>}, {pipeline_mode = #tpu.pipeline_mode<synchronous>, transform_indices = @transform_3, window_bounds = array<i64: 1, 32>}, {transform_indices = @transform_4, window_bounds = array<i64: 1, 8, 8>}, {pipeline_mode = #tpu.pipeline_mode<synchronous>, transform_indices = @transform_5, window_bounds = array<i64: 32, 96>}, {pipeline_mode = #tpu.pipeline_mode<synchronous>, transform_indices = @transform_6, window_bounds = array<i64: 1, 96>}, {pipeline_mode = #tpu.pipeline_mode<synchronous>, transform_indices = @transform_7, window_bounds = array<i64: 32, 32>}, {pipeline_mode = #tpu.pipeline_mode<synchronous>, transform_indices = @transform_8, window_bounds = array<i64: 1, 32>}, {pipeline_mode = #tpu.pipeline_mode<synchronous>, transform_indices = @transform_9, window_bounds = array<i64: 1, 32>}, {pipeline_mode = #tpu.pipeline_mode<synchronous>, transform_indices = @transform_10, window_bounds = array<i64: 32, 32>}, {pipeline_mode = #tpu.pipeline_mode<synchronous>, transform_indices = @transform_11, window_bounds = array<i64: 1, 32>}, {transform_indices = @transform_12, window_bounds = array<i64: 1, 8, 32>}, {transform_indices = @transform_13, window_bounds = array<i64: 1, 4, 8, 8>}]} {
    %c0 = arith.constant 0 : index
    %c0_0 = arith.constant 0 : index
    %c0_1 = arith.constant 0 : index
    %0 = vector.load %arg1[%c0, %c0_0, %c0_1] : memref<1x8x32xf32, #tpu.memory_space<vmem>>, vector<1x8x32xf32>
    %1 = vector.shape_cast %0 : vector<1x8x32xf32> to vector<8x32xf32>
    %cst = arith.constant dense<0.000000e+00> : vector<8xf32>
    %2 = vector.multi_reduction <add>, %1, %cst [1] : vector<8x32xf32> to vector<8xf32>
    %3 = vector.shape_cast %2 : vector<8xf32> to vector<8x1xf32>
    %cst_2 = arith.constant 3.200000e+01 : f32
    %4 = vector.broadcast %cst_2 : f32 to vector<8x1xf32>
    %5 = arith.divf %3, %4 : vector<8x1xf32>
    %6 = vector.broadcast %5 : vector<8x1xf32> to vector<8x32xf32>
    %7 = arith.subf %1, %6 : vector<8x32xf32>
    %8 = arith.mulf %7, %7 : vector<8x32xf32>
    %cst_3 = arith.constant dense<0.000000e+00> : vector<8xf32>
    %9 = vector.multi_reduction <add>, %8, %cst_3 [1] : vector<8x32xf32> to vector<8xf32>
    %10 = vector.shape_cast %9 : vector<8xf32> to vector<8x1xf32>
    %cst_4 = arith.constant 3.100000e+01 : f32
    %11 = vector.broadcast %cst_4 : f32 to vector<8x1xf32>
    %12 = arith.divf %10, %11 : vector<8x1xf32>
    %c0_5 = arith.constant 0 : index
    %c0_6 = arith.constant 0 : index
    %13 = vector.load %arg3[%c0_5, %c0_6] : memref<1x32xf32, #tpu.memory_space<vmem>>, vector<1x32xf32>
    %14 = vector.broadcast %5 : vector<8x1xf32> to vector<8x32xf32>
    %15 = arith.subf %1, %14 : vector<8x32xf32>
    %16 = math.sqrt %12 : vector<8x1xf32>
    %cst_7 = arith.constant 9.99999997E-7 : f32
    %17 = vector.broadcast %cst_7 : f32 to vector<8x1xf32>
    %18 = arith.addf %16, %17 : vector<8x1xf32>
    %19 = vector.broadcast %18 : vector<8x1xf32> to vector<8x32xf32>
    %20 = arith.divf %15, %19 : vector<8x32xf32>
    %21 = vector.broadcast %13 : vector<1x32xf32> to vector<8x32xf32>
    %22 = arith.mulf %21, %20 : vector<8x32xf32>
    %c0_8 = arith.constant 0 : index
    %c0_9 = arith.constant 0 : index
    %23 = vector.load %arg4[%c0_8, %c0_9] : memref<1x32xf32, #tpu.memory_space<vmem>>, vector<1x32xf32>
    %24 = vector.broadcast %23 : vector<1x32xf32> to vector<8x32xf32>
    %25 = arith.addf %22, %24 : vector<8x32xf32>
    %c0_10 = arith.constant 0 : index
    %c0_11 = arith.constant 0 : index
    %26 = vector.load %arg6[%c0_10, %c0_11] : memref<32x96xf32, #tpu.memory_space<vmem>>, vector<32x96xf32>
    %cst_12 = arith.constant dense<0.000000e+00> : vector<8x96xf32>
    %27 = tpu.matmul %25, %26, %cst_12 {dimension_numbers = #tpu.dot_dimension_numbers<[1], [0], [0], [1], [0, 0, 1, 1], [], []>} : vector<8x32xf32>, vector<32x96xf32>, vector<8x96xf32> -> vector<8x96xf32>
    %c0_13 = arith.constant 0 : index
    %c0_14 = arith.constant 0 : index
    %28 = vector.load %arg7[%c0_13, %c0_14] : memref<1x96xf32, #tpu.memory_space<vmem>>, vector<1x96xf32>
    %29 = vector.broadcast %28 : vector<1x96xf32> to vector<8x96xf32>
    %30 = arith.addf %27, %29 : vector<8x96xf32>
    %c0_15 = arith.constant 0 : index
    %c0_16 = arith.constant 0 : index
    %31 = vector.load %arg2[%c0_15, %c0_16] : memref<8x32xf32, #tpu.memory_space<vmem>>, vector<8x32xf32>
    %c0_17 = arith.constant 0 : index
    %c0_18 = arith.constant 0 : index
    %32 = vector.load %arg8[%c0_17, %c0_18] : memref<32x32xf32, #tpu.memory_space<vmem>>, vector<32x32xf32>
    %cst_19 = arith.constant dense<0.000000e+00> : vector<8x32xf32>
    %33 = tpu.matmul %31, %32, %cst_19 {dimension_numbers = #tpu.dot_dimension_numbers<[1], [0], [0], [1], [0, 0, 1, 1], [], []>} : vector<8x32xf32>, vector<32x32xf32>, vector<8x32xf32> -> vector<8x32xf32>
    %34 = vector.extract_strided_slice %30 {offsets = [0, 0], sizes = [8, 32], strides = [1, 1]} : vector<8x96xf32> to vector<8x32xf32>
    %35 = vector.extract_strided_slice %30 {offsets = [0, 32], sizes = [8, 32], strides = [1, 1]} : vector<8x96xf32> to vector<8x32xf32>
    %36 = vector.extract_strided_slice %30 {offsets = [0, 64], sizes = [8, 32], strides = [1, 1]} : vector<8x96xf32> to vector<8x32xf32>
    %c0_20 = arith.constant 0 : index
    %c0_21 = arith.constant 0 : index
    %37 = vector.load %arg9[%c0_20, %c0_21] : memref<1x32xf32, #tpu.memory_space<vmem>>, vector<1x32xf32>
    %38 = vector.broadcast %37 : vector<1x32xf32> to vector<8x32xf32>
    %39 = arith.addf %34, %38 : vector<8x32xf32>
    %c0_22 = arith.constant 0 : index
    %c0_23 = arith.constant 0 : index
    %40 = vector.load %arg10[%c0_22, %c0_23] : memref<1x32xf32, #tpu.memory_space<vmem>>, vector<1x32xf32>
    %41 = vector.broadcast %40 : vector<1x32xf32> to vector<8x32xf32>
    %42 = arith.addf %34, %41 : vector<8x32xf32>
    %c0_24 = arith.constant 0 : index
    %c0_25 = arith.constant 0 : index
    %c0_26 = arith.constant 0 : index
    %43 = vector.load %arg5[%c0_24, %c0_25, %c0_26] : memref<1x8x8xi32, #tpu.memory_space<vmem>>, vector<1x8x8xi32>
    %44 = vector.shape_cast %43 : vector<1x8x8xi32> to vector<8x8xi32>
    %45 = tpu.iota {dimensions = array<i32: 0>} : vector<8x8xi32>
    %46 = tpu.iota {dimensions = array<i32: 1>} : vector<8x8xi32>
    %c7_i32 = arith.constant 7 : i32
    %47 = vector.broadcast %c7_i32 : i32 to vector<8x8xi32>
    %48 = arith.addi %46, %47 : vector<8x8xi32>
    %49 = arith.subi %48, %45 : vector<8x8xi32>
    %50 = arith.subi %46, %45 : vector<8x8xi32>
    %c2_i32 = arith.constant 2 : i32
    %51 = vector.broadcast %c2_i32 : i32 to vector<8x8xi32>
    %52 = arith.subi %50, %51 : vector<8x8xi32>
    %c0_i32 = arith.constant 0 : i32
    %53 = vector.broadcast %c0_i32 : i32 to vector<8x8xi32>
    %54 = arith.cmpi eq, %49, %53 : vector<8x8xi32>
    %55 = arith.extui %54 : vector<8x8xi1> to vector<8x8xi32>
    %56 = arith.sitofp %55 : vector<8x8xi32> to vector<8x8xf32>
    %c1_i32 = arith.constant 1 : i32
    %57 = vector.broadcast %c1_i32 : i32 to vector<8x8xi32>
    %58 = arith.cmpi eq, %49, %57 : vector<8x8xi32>
    %59 = arith.extui %58 : vector<8x8xi1> to vector<8x8xi32>
    %60 = arith.sitofp %59 : vector<8x8xi32> to vector<8x8xf32>
    %c2_i32_27 = arith.constant 2 : i32
    %61 = vector.broadcast %c2_i32_27 : i32 to vector<8x8xi32>
    %62 = arith.cmpi eq, %49, %61 : vector<8x8xi32>
    %63 = arith.extui %62 : vector<8x8xi1> to vector<8x8xi32>
    %64 = arith.sitofp %63 : vector<8x8xi32> to vector<8x8xf32>
    %c3_i32 = arith.constant 3 : i32
    %65 = vector.broadcast %c3_i32 : i32 to vector<8x8xi32>
    %66 = arith.cmpi eq, %49, %65 : vector<8x8xi32>
    %67 = arith.extui %66 : vector<8x8xi1> to vector<8x8xi32>
    %68 = arith.sitofp %67 : vector<8x8xi32> to vector<8x8xf32>
    %c4_i32 = arith.constant 4 : i32
    %69 = vector.broadcast %c4_i32 : i32 to vector<8x8xi32>
    %70 = arith.cmpi eq, %49, %69 : vector<8x8xi32>
    %71 = arith.extui %70 : vector<8x8xi1> to vector<8x8xi32>
    %72 = arith.sitofp %71 : vector<8x8xi32> to vector<8x8xf32>
    %c5_i32 = arith.constant 5 : i32
    %73 = vector.broadcast %c5_i32 : i32 to vector<8x8xi32>
    %74 = arith.cmpi eq, %49, %73 : vector<8x8xi32>
    %75 = arith.extui %74 : vector<8x8xi1> to vector<8x8xi32>
    %76 = arith.sitofp %75 : vector<8x8xi32> to vector<8x8xf32>
    %c6_i32 = arith.constant 6 : i32
    %77 = vector.broadcast %c6_i32 : i32 to vector<8x8xi32>
    %78 = arith.cmpi eq, %49, %77 : vector<8x8xi32>
    %79 = arith.extui %78 : vector<8x8xi1> to vector<8x8xi32>
    %80 = arith.sitofp %79 : vector<8x8xi32> to vector<8x8xf32>
    %c7_i32_28 = arith.constant 7 : i32
    %81 = vector.broadcast %c7_i32_28 : i32 to vector<8x8xi32>
    %82 = arith.cmpi eq, %49, %81 : vector<8x8xi32>
    %83 = arith.extui %82 : vector<8x8xi1> to vector<8x8xi32>
    %84 = arith.sitofp %83 : vector<8x8xi32> to vector<8x8xf32>
    %c0_i32_29 = arith.constant 0 : i32
    %85 = vector.broadcast %c0_i32_29 : i32 to vector<8x8xi32>
    %86 = arith.cmpi eq, %52, %85 : vector<8x8xi32>
    %87 = arith.extui %86 : vector<8x8xi1> to vector<8x8xi32>
    %88 = arith.sitofp %87 : vector<8x8xi32> to vector<8x8xf32>
    %c1_i32_30 = arith.constant 1 : i32
    %89 = vector.broadcast %c1_i32_30 : i32 to vector<8x8xi32>
    %90 = arith.cmpi eq, %52, %89 : vector<8x8xi32>
    %91 = arith.extui %90 : vector<8x8xi1> to vector<8x8xi32>
    %92 = arith.sitofp %91 : vector<8x8xi32> to vector<8x8xf32>
    %c2_i32_31 = arith.constant 2 : i32
    %93 = vector.broadcast %c2_i32_31 : i32 to vector<8x8xi32>
    %94 = arith.cmpi eq, %52, %93 : vector<8x8xi32>
    %95 = arith.extui %94 : vector<8x8xi1> to vector<8x8xi32>
    %96 = arith.sitofp %95 : vector<8x8xi32> to vector<8x8xf32>
    %c3_i32_32 = arith.constant 3 : i32
    %97 = vector.broadcast %c3_i32_32 : i32 to vector<8x8xi32>
    %98 = arith.cmpi eq, %52, %97 : vector<8x8xi32>
    %99 = arith.extui %98 : vector<8x8xi1> to vector<8x8xi32>
    %100 = arith.sitofp %99 : vector<8x8xi32> to vector<8x8xf32>
    %c4_i32_33 = arith.constant 4 : i32
    %101 = vector.broadcast %c4_i32_33 : i32 to vector<8x8xi32>
    %102 = arith.cmpi eq, %52, %101 : vector<8x8xi32>
    %103 = arith.extui %102 : vector<8x8xi1> to vector<8x8xi32>
    %104 = arith.sitofp %103 : vector<8x8xi32> to vector<8x8xf32>
    %c5_i32_34 = arith.constant 5 : i32
    %105 = vector.broadcast %c5_i32_34 : i32 to vector<8x8xi32>
    %106 = arith.cmpi eq, %52, %105 : vector<8x8xi32>
    %107 = arith.extui %106 : vector<8x8xi1> to vector<8x8xi32>
    %108 = arith.sitofp %107 : vector<8x8xi32> to vector<8x8xf32>
    %c6_i32_35 = arith.constant 6 : i32
    %109 = vector.broadcast %c6_i32_35 : i32 to vector<8x8xi32>
    %110 = arith.cmpi eq, %52, %109 : vector<8x8xi32>
    %111 = arith.extui %110 : vector<8x8xi1> to vector<8x8xi32>
    %112 = arith.sitofp %111 : vector<8x8xi32> to vector<8x8xf32>
    %c7_i32_36 = arith.constant 7 : i32
    %113 = vector.broadcast %c7_i32_36 : i32 to vector<8x8xi32>
    %114 = arith.cmpi eq, %52, %113 : vector<8x8xi32>
    %115 = arith.extui %114 : vector<8x8xi1> to vector<8x8xi32>
    %116 = arith.sitofp %115 : vector<8x8xi32> to vector<8x8xf32>
    %c1_i32_37 = arith.constant 1 : i32
    %117 = vector.broadcast %c1_i32_37 : i32 to vector<8x8xi32>
    %118 = arith.addi %45, %117 : vector<8x8xi32>
    %119 = arith.cmpi eq, %46, %118 : vector<8x8xi32>
    %120 = arith.extui %119 : vector<8x8xi1> to vector<8x8xi32>
    %121 = arith.sitofp %120 : vector<8x8xi32> to vector<8x8xf32>
    %cst_38 = arith.constant 0.000000e+00 : f32
    %122 = vector.broadcast %cst_38 : f32 to vector<8x32xf32>
    %123 = vector.extract_strided_slice %39 {offsets = [0, 0], sizes = [8, 8], strides = [1, 1]} : vector<8x32xf32> to vector<8x8xf32>
    %124 = vector.extract_strided_slice %42 {offsets = [0, 0], sizes = [8, 8], strides = [1, 1]} : vector<8x32xf32> to vector<8x8xf32>
    %125 = vector.extract_strided_slice %35 {offsets = [0, 0], sizes = [8, 8], strides = [1, 1]} : vector<8x32xf32> to vector<8x8xf32>
    %126 = vector.extract_strided_slice %36 {offsets = [0, 0], sizes = [8, 8], strides = [1, 1]} : vector<8x32xf32> to vector<8x8xf32>
    %127 = vector.extract_strided_slice %33 {offsets = [0, 0], sizes = [8, 8], strides = [1, 1]} : vector<8x32xf32> to vector<8x8xf32>
    %cst_39 = arith.constant dense<0.000000e+00> : vector<8x8xf32>
    %128 = tpu.matmul %123, %125, %cst_39 {dimension_numbers = #tpu.dot_dimension_numbers<[1], [1], [0], [0], [0, 0, 1, 0], [], []>} : vector<8x8xf32>, vector<8x8xf32>, vector<8x8xf32> -> vector<8x8xf32>
    %cst_40 = arith.constant dense<0.000000e+00> : vector<8x8xf32>
    %129 = tpu.matmul %124, %127, %cst_40 {dimension_numbers = #tpu.dot_dimension_numbers<[1], [1], [0], [0], [0, 0, 1, 0], [], []>} : vector<8x8xf32>, vector<8x8xf32>, vector<8x8xf32> -> vector<8x8xf32>
    %cst_41 = arith.constant dense<0.000000e+00> : vector<8x8xf32>
    %130 = tpu.matmul %121, %129, %cst_41 {dimension_numbers = #tpu.dot_dimension_numbers<[1], [0], [0], [1], [0, 0, 1, 1], [], []>} : vector<8x8xf32>, vector<8x8xf32>, vector<8x8xf32> -> vector<8x8xf32>
    %cst_42 = arith.constant 0.000000e+00 : f32
    %131 = vector.broadcast %cst_42 : f32 to vector<8x8xf32>
    %132 = vector.extract_strided_slice %129 {offsets = [0, 0], sizes = [8, 1], strides = [1, 1]} : vector<8x8xf32> to vector<8x1xf32>
    %133 = vector.broadcast %132 : vector<8x1xf32> to vector<8x8xf32>
    %134 = arith.mulf %133, %56 : vector<8x8xf32>
    %135 = arith.addf %131, %134 : vector<8x8xf32>
    %136 = vector.extract_strided_slice %130 {offsets = [0, 0], sizes = [8, 1], strides = [1, 1]} : vector<8x8xf32> to vector<8x1xf32>
    %137 = vector.broadcast %136 : vector<8x1xf32> to vector<8x8xf32>
    %138 = arith.mulf %137, %88 : vector<8x8xf32>
    %139 = arith.addf %135, %138 : vector<8x8xf32>
    %140 = vector.extract_strided_slice %129 {offsets = [0, 1], sizes = [8, 1], strides = [1, 1]} : vector<8x8xf32> to vector<8x1xf32>
    %141 = vector.broadcast %140 : vector<8x1xf32> to vector<8x8xf32>
    %142 = arith.mulf %141, %60 : vector<8x8xf32>
    %143 = arith.addf %139, %142 : vector<8x8xf32>
    %144 = vector.extract_strided_slice %130 {offsets = [0, 1], sizes = [8, 1], strides = [1, 1]} : vector<8x8xf32> to vector<8x1xf32>
    %145 = vector.broadcast %144 : vector<8x1xf32> to vector<8x8xf32>
    %146 = arith.mulf %145, %92 : vector<8x8xf32>
    %147 = arith.addf %143, %146 : vector<8x8xf32>
    %148 = vector.extract_strided_slice %129 {offsets = [0, 2], sizes = [8, 1], strides = [1, 1]} : vector<8x8xf32> to vector<8x1xf32>
    %149 = vector.broadcast %148 : vector<8x1xf32> to vector<8x8xf32>
    %150 = arith.mulf %149, %64 : vector<8x8xf32>
    %151 = arith.addf %147, %150 : vector<8x8xf32>
    %152 = vector.extract_strided_slice %130 {offsets = [0, 2], sizes = [8, 1], strides = [1, 1]} : vector<8x8xf32> to vector<8x1xf32>
    %153 = vector.broadcast %152 : vector<8x1xf32> to vector<8x8xf32>
    %154 = arith.mulf %153, %96 : vector<8x8xf32>
    %155 = arith.addf %151, %154 : vector<8x8xf32>
    %156 = vector.extract_strided_slice %129 {offsets = [0, 3], sizes = [8, 1], strides = [1, 1]} : vector<8x8xf32> to vector<8x1xf32>
    %157 = vector.broadcast %156 : vector<8x1xf32> to vector<8x8xf32>
    %158 = arith.mulf %157, %68 : vector<8x8xf32>
    %159 = arith.addf %155, %158 : vector<8x8xf32>
    %160 = vector.extract_strided_slice %130 {offsets = [0, 3], sizes = [8, 1], strides = [1, 1]} : vector<8x8xf32> to vector<8x1xf32>
    %161 = vector.broadcast %160 : vector<8x1xf32> to vector<8x8xf32>
    %162 = arith.mulf %161, %100 : vector<8x8xf32>
    %163 = arith.addf %159, %162 : vector<8x8xf32>
    %164 = vector.extract_strided_slice %129 {offsets = [0, 4], sizes = [8, 1], strides = [1, 1]} : vector<8x8xf32> to vector<8x1xf32>
    %165 = vector.broadcast %164 : vector<8x1xf32> to vector<8x8xf32>
    %166 = arith.mulf %165, %72 : vector<8x8xf32>
    %167 = arith.addf %163, %166 : vector<8x8xf32>
    %168 = vector.extract_strided_slice %130 {offsets = [0, 4], sizes = [8, 1], strides = [1, 1]} : vector<8x8xf32> to vector<8x1xf32>
    %169 = vector.broadcast %168 : vector<8x1xf32> to vector<8x8xf32>
    %170 = arith.mulf %169, %104 : vector<8x8xf32>
    %171 = arith.addf %167, %170 : vector<8x8xf32>
    %172 = vector.extract_strided_slice %129 {offsets = [0, 5], sizes = [8, 1], strides = [1, 1]} : vector<8x8xf32> to vector<8x1xf32>
    %173 = vector.broadcast %172 : vector<8x1xf32> to vector<8x8xf32>
    %174 = arith.mulf %173, %76 : vector<8x8xf32>
    %175 = arith.addf %171, %174 : vector<8x8xf32>
    %176 = vector.extract_strided_slice %130 {offsets = [0, 5], sizes = [8, 1], strides = [1, 1]} : vector<8x8xf32> to vector<8x1xf32>
    %177 = vector.broadcast %176 : vector<8x1xf32> to vector<8x8xf32>
    %178 = arith.mulf %177, %108 : vector<8x8xf32>
    %179 = arith.addf %175, %178 : vector<8x8xf32>
    %180 = vector.extract_strided_slice %129 {offsets = [0, 6], sizes = [8, 1], strides = [1, 1]} : vector<8x8xf32> to vector<8x1xf32>
    %181 = vector.broadcast %180 : vector<8x1xf32> to vector<8x8xf32>
    %182 = arith.mulf %181, %80 : vector<8x8xf32>
    %183 = arith.addf %179, %182 : vector<8x8xf32>
    %184 = vector.extract_strided_slice %130 {offsets = [0, 6], sizes = [8, 1], strides = [1, 1]} : vector<8x8xf32> to vector<8x1xf32>
    %185 = vector.broadcast %184 : vector<8x1xf32> to vector<8x8xf32>
    %186 = arith.mulf %185, %112 : vector<8x8xf32>
    %187 = arith.addf %183, %186 : vector<8x8xf32>
    %188 = vector.extract_strided_slice %129 {offsets = [0, 7], sizes = [8, 1], strides = [1, 1]} : vector<8x8xf32> to vector<8x1xf32>
    %189 = vector.broadcast %188 : vector<8x1xf32> to vector<8x8xf32>
    %190 = arith.mulf %189, %84 : vector<8x8xf32>
    %191 = arith.addf %187, %190 : vector<8x8xf32>
    %192 = vector.extract_strided_slice %130 {offsets = [0, 7], sizes = [8, 1], strides = [1, 1]} : vector<8x8xf32> to vector<8x1xf32>
    %193 = vector.broadcast %192 : vector<8x1xf32> to vector<8x8xf32>
    %194 = arith.mulf %193, %116 : vector<8x8xf32>
    %195 = arith.addf %191, %194 : vector<8x8xf32>
    %196 = arith.addf %128, %195 : vector<8x8xf32>
    %cst_43 = arith.constant 0.176776692 : f32
    %197 = vector.broadcast %cst_43 : f32 to vector<8x8xf32>
    %198 = arith.mulf %196, %197 : vector<8x8xf32>
    %c0_i32_44 = arith.constant 0 : i32
    %199 = vector.broadcast %c0_i32_44 : i32 to vector<8x8xi32>
    %200 = arith.cmpi ne, %44, %199 : vector<8x8xi32>
    %cst_45 = arith.constant -1.000000e+09 : f32
    %201 = vector.broadcast %cst_45 : f32 to vector<8x8xf32>
    %202 = arith.select %200, %201, %198 : vector<8x8xi1>, vector<8x8xf32>
    %cst_46 = arith.constant dense<0xFF800000> : vector<8xf32>
    %203 = vector.multi_reduction <maximumf>, %202, %cst_46 [1] : vector<8x8xf32> to vector<8xf32>
    %204 = vector.shape_cast %203 : vector<8xf32> to vector<8x1xf32>
    %205 = vector.broadcast %204 : vector<8x1xf32> to vector<8x8xf32>
    %206 = arith.subf %202, %205 : vector<8x8xf32>
    %207 = math.exp %206 : vector<8x8xf32>
    %cst_47 = arith.constant dense<0.000000e+00> : vector<8xf32>
    %208 = vector.multi_reduction <add>, %207, %cst_47 [1] : vector<8x8xf32> to vector<8xf32>
    %209 = vector.shape_cast %208 : vector<8xf32> to vector<8x1xf32>
    %210 = tpu.reciprocal %209 {approx = true} : vector<8x1xf32> -> vector<8x1xf32>
    %211 = vector.broadcast %210 : vector<8x1xf32> to vector<8x8xf32>
    %212 = arith.mulf %207, %211 : vector<8x8xf32>
    %c0_48 = arith.constant 0 : index
    %c0_49 = arith.constant 0 : index
    %c0_50 = arith.constant 0 : index
    %c0_51 = arith.constant 0 : index
    %213 = vector.load %arg14[%c0_48, %c0_49, %c0_50, %c0_51] : memref<1x4x8x8xf32, #tpu.memory_space<vmem>>, vector<1x1x8x8xf32>
    %214 = vector.shape_cast %213 : vector<1x1x8x8xf32> to vector<8x8xf32>
    %215 = vector.shape_cast %212 : vector<8x8xf32> to vector<1x1x8x8xf32>
    tpu.vector_store %arg14[%c0_48, %c0_49, %c0_50, %c0_51], %215 {strides = array<i32>} : memref<1x4x8x8xf32, #tpu.memory_space<vmem>>, vector<1x1x8x8xf32>,
    %cst_52 = arith.constant dense<0.000000e+00> : vector<8x8xf32>
    %216 = tpu.matmul %212, %126, %cst_52 {dimension_numbers = #tpu.dot_dimension_numbers<[1], [0], [0], [1], [0, 0, 1, 1], [], []>} : vector<8x8xf32>, vector<8x8xf32>, vector<8x8xf32> -> vector<8x8xf32>
    %c0_53 = arith.constant 0 : index
    %c0_54 = arith.constant 0 : index
    %217 = vector.load %arg11[%c0_53, %c0_54] : memref<32x32xf32, #tpu.memory_space<vmem>>, vector<8x32xf32>
    %cst_55 = arith.constant dense<0.000000e+00> : vector<8x32xf32>
    %218 = tpu.matmul %216, %217, %cst_55 {dimension_numbers = #tpu.dot_dimension_numbers<[1], [0], [0], [1], [0, 0, 1, 1], [], []>} : vector<8x8xf32>, vector<8x32xf32>, vector<8x32xf32> -> vector<8x32xf32>
    %219 = arith.addf %122, %218 : vector<8x32xf32>
    %220 = vector.extract_strided_slice %39 {offsets = [0, 8], sizes = [8, 8], strides = [1, 1]} : vector<8x32xf32> to vector<8x8xf32>
    %221 = vector.extract_strided_slice %42 {offsets = [0, 8], sizes = [8, 8], strides = [1, 1]} : vector<8x32xf32> to vector<8x8xf32>
    %222 = vector.extract_strided_slice %35 {offsets = [0, 8], sizes = [8, 8], strides = [1, 1]} : vector<8x32xf32> to vector<8x8xf32>
    %223 = vector.extract_strided_slice %36 {offsets = [0, 8], sizes = [8, 8], strides = [1, 1]} : vector<8x32xf32> to vector<8x8xf32>
    %224 = vector.extract_strided_slice %33 {offsets = [0, 8], sizes = [8, 8], strides = [1, 1]} : vector<8x32xf32> to vector<8x8xf32>
    %cst_56 = arith.constant dense<0.000000e+00> : vector<8x8xf32>
    %225 = tpu.matmul %220, %222, %cst_56 {dimension_numbers = #tpu.dot_dimension_numbers<[1], [1], [0], [0], [0, 0, 1, 0], [], []>} : vector<8x8xf32>, vector<8x8xf32>, vector<8x8xf32> -> vector<8x8xf32>
    %cst_57 = arith.constant dense<0.000000e+00> : vector<8x8xf32>
    %226 = tpu.matmul %221, %224, %cst_57 {dimension_numbers = #tpu.dot_dimension_numbers<[1], [1], [0], [0], [0, 0, 1, 0], [], []>} : vector<8x8xf32>, vector<8x8xf32>, vector<8x8xf32> -> vector<8x8xf32>
    %cst_58 = arith.constant dense<0.000000e+00> : vector<8x8xf32>
    %227 = tpu.matmul %121, %226, %cst_58 {dimension_numbers = #tpu.dot_dimension_numbers<[1], [0], [0], [1], [0, 0, 1, 1], [], []>} : vector<8x8xf32>, vector<8x8xf32>, vector<8x8xf32> -> vector<8x8xf32>
    %cst_59 = arith.constant 0.000000e+00 : f32
    %228 = vector.broadcast %cst_59 : f32 to vector<8x8xf32>
    %229 = vector.extract_strided_slice %226 {offsets = [0, 0], sizes = [8, 1], strides = [1, 1]} : vector<8x8xf32> to vector<8x1xf32>
    %230 = vector.broadcast %229 : vector<8x1xf32> to vector<8x8xf32>
    %231 = arith.mulf %230, %56 : vector<8x8xf32>
    %232 = arith.addf %228, %231 : vector<8x8xf32>
    %233 = vector.extract_strided_slice %227 {offsets = [0, 0], sizes = [8, 1], strides = [1, 1]} : vector<8x8xf32> to vector<8x1xf32>
    %234 = vector.broadcast %233 : vector<8x1xf32> to vector<8x8xf32>
    %235 = arith.mulf %234, %88 : vector<8x8xf32>
    %236 = arith.addf %232, %235 : vector<8x8xf32>
    %237 = vector.extract_strided_slice %226 {offsets = [0, 1], sizes = [8, 1], strides = [1, 1]} : vector<8x8xf32> to vector<8x1xf32>
    %238 = vector.broadcast %237 : vector<8x1xf32> to vector<8x8xf32>
    %239 = arith.mulf %238, %60 : vector<8x8xf32>
    %240 = arith.addf %236, %239 : vector<8x8xf32>
    %241 = vector.extract_strided_slice %227 {offsets = [0, 1], sizes = [8, 1], strides = [1, 1]} : vector<8x8xf32> to vector<8x1xf32>
    %242 = vector.broadcast %241 : vector<8x1xf32> to vector<8x8xf32>
    %243 = arith.mulf %242, %92 : vector<8x8xf32>
    %244 = arith.addf %240, %243 : vector<8x8xf32>
    %245 = vector.extract_strided_slice %226 {offsets = [0, 2], sizes = [8, 1], strides = [1, 1]} : vector<8x8xf32> to vector<8x1xf32>
    %246 = vector.broadcast %245 : vector<8x1xf32> to vector<8x8xf32>
    %247 = arith.mulf %246, %64 : vector<8x8xf32>
    %248 = arith.addf %244, %247 : vector<8x8xf32>
    %249 = vector.extract_strided_slice %227 {offsets = [0, 2], sizes = [8, 1], strides = [1, 1]} : vector<8x8xf32> to vector<8x1xf32>
    %250 = vector.broadcast %249 : vector<8x1xf32> to vector<8x8xf32>
    %251 = arith.mulf %250, %96 : vector<8x8xf32>
    %252 = arith.addf %248, %251 : vector<8x8xf32>
    %253 = vector.extract_strided_slice %226 {offsets = [0, 3], sizes = [8, 1], strides = [1, 1]} : vector<8x8xf32> to vector<8x1xf32>
    %254 = vector.broadcast %253 : vector<8x1xf32> to vector<8x8xf32>
    %255 = arith.mulf %254, %68 : vector<8x8xf32>
    %256 = arith.addf %252, %255 : vector<8x8xf32>
    %257 = vector.extract_strided_slice %227 {offsets = [0, 3], sizes = [8, 1], strides = [1, 1]} : vector<8x8xf32> to vector<8x1xf32>
    %258 = vector.broadcast %257 : vector<8x1xf32> to vector<8x8xf32>
    %259 = arith.mulf %258, %100 : vector<8x8xf32>
    %260 = arith.addf %256, %259 : vector<8x8xf32>
    %261 = vector.extract_strided_slice %226 {offsets = [0, 4], sizes = [8, 1], strides = [1, 1]} : vector<8x8xf32> to vector<8x1xf32>
    %262 = vector.broadcast %261 : vector<8x1xf32> to vector<8x8xf32>
    %263 = arith.mulf %262, %72 : vector<8x8xf32>
    %264 = arith.addf %260, %263 : vector<8x8xf32>
    %265 = vector.extract_strided_slice %227 {offsets = [0, 4], sizes = [8, 1], strides = [1, 1]} : vector<8x8xf32> to vector<8x1xf32>
    %266 = vector.broadcast %265 : vector<8x1xf32> to vector<8x8xf32>
    %267 = arith.mulf %266, %104 : vector<8x8xf32>
    %268 = arith.addf %264, %267 : vector<8x8xf32>
    %269 = vector.extract_strided_slice %226 {offsets = [0, 5], sizes = [8, 1], strides = [1, 1]} : vector<8x8xf32> to vector<8x1xf32>
    %270 = vector.broadcast %269 : vector<8x1xf32> to vector<8x8xf32>
    %271 = arith.mulf %270, %76 : vector<8x8xf32>
    %272 = arith.addf %268, %271 : vector<8x8xf32>
    %273 = vector.extract_strided_slice %227 {offsets = [0, 5], sizes = [8, 1], strides = [1, 1]} : vector<8x8xf32> to vector<8x1xf32>
    %274 = vector.broadcast %273 : vector<8x1xf32> to vector<8x8xf32>
    %275 = arith.mulf %274, %108 : vector<8x8xf32>
    %276 = arith.addf %272, %275 : vector<8x8xf32>
    %277 = vector.extract_strided_slice %226 {offsets = [0, 6], sizes = [8, 1], strides = [1, 1]} : vector<8x8xf32> to vector<8x1xf32>
    %278 = vector.broadcast %277 : vector<8x1xf32> to vector<8x8xf32>
    %279 = arith.mulf %278, %80 : vector<8x8xf32>
    %280 = arith.addf %276, %279 : vector<8x8xf32>
    %281 = vector.extract_strided_slice %227 {offsets = [0, 6], sizes = [8, 1], strides = [1, 1]} : vector<8x8xf32> to vector<8x1xf32>
    %282 = vector.broadcast %281 : vector<8x1xf32> to vector<8x8xf32>
    %283 = arith.mulf %282, %112 : vector<8x8xf32>
    %284 = arith.addf %280, %283 : vector<8x8xf32>
    %285 = vector.extract_strided_slice %226 {offsets = [0, 7], sizes = [8, 1], strides = [1, 1]} : vector<8x8xf32> to vector<8x1xf32>
    %286 = vector.broadcast %285 : vector<8x1xf32> to vector<8x8xf32>
    %287 = arith.mulf %286, %84 : vector<8x8xf32>
    %288 = arith.addf %284, %287 : vector<8x8xf32>
    %289 = vector.extract_strided_slice %227 {offsets = [0, 7], sizes = [8, 1], strides = [1, 1]} : vector<8x8xf32> to vector<8x1xf32>
    %290 = vector.broadcast %289 : vector<8x1xf32> to vector<8x8xf32>
    %291 = arith.mulf %290, %116 : vector<8x8xf32>
    %292 = arith.addf %288, %291 : vector<8x8xf32>
    %293 = arith.addf %225, %292 : vector<8x8xf32>
    %cst_60 = arith.constant 0.176776692 : f32
    %294 = vector.broadcast %cst_60 : f32 to vector<8x8xf32>
    %295 = arith.mulf %293, %294 : vector<8x8xf32>
    %c0_i32_61 = arith.constant 0 : i32
    %296 = vector.broadcast %c0_i32_61 : i32 to vector<8x8xi32>
    %297 = arith.cmpi ne, %44, %296 : vector<8x8xi32>
    %cst_62 = arith.constant -1.000000e+09 : f32
    %298 = vector.broadcast %cst_62 : f32 to vector<8x8xf32>
    %299 = arith.select %297, %298, %295 : vector<8x8xi1>, vector<8x8xf32>
    %cst_63 = arith.constant dense<0xFF800000> : vector<8xf32>
    %300 = vector.multi_reduction <maximumf>, %299, %cst_63 [1] : vector<8x8xf32> to vector<8xf32>
    %301 = vector.shape_cast %300 : vector<8xf32> to vector<8x1xf32>
    %302 = vector.broadcast %301 : vector<8x1xf32> to vector<8x8xf32>
    %303 = arith.subf %299, %302 : vector<8x8xf32>
    %304 = math.exp %303 : vector<8x8xf32>
    %cst_64 = arith.constant dense<0.000000e+00> : vector<8xf32>
    %305 = vector.multi_reduction <add>, %304, %cst_64 [1] : vector<8x8xf32> to vector<8xf32>
    %306 = vector.shape_cast %305 : vector<8xf32> to vector<8x1xf32>
    %307 = tpu.reciprocal %306 {approx = true} : vector<8x1xf32> -> vector<8x1xf32>
    %308 = vector.broadcast %307 : vector<8x1xf32> to vector<8x8xf32>
    %309 = arith.mulf %304, %308 : vector<8x8xf32>
    %c0_65 = arith.constant 0 : index
    %c1 = arith.constant 1 : index
    %c0_66 = arith.constant 0 : index
    %c0_67 = arith.constant 0 : index
    %310 = vector.load %arg14[%c0_65, %c1, %c0_66, %c0_67] : memref<1x4x8x8xf32, #tpu.memory_space<vmem>>, vector<1x1x8x8xf32>
    %311 = vector.shape_cast %310 : vector<1x1x8x8xf32> to vector<8x8xf32>
    %312 = vector.shape_cast %309 : vector<8x8xf32> to vector<1x1x8x8xf32>
    tpu.vector_store %arg14[%c0_65, %c1, %c0_66, %c0_67], %312 {strides = array<i32>} : memref<1x4x8x8xf32, #tpu.memory_space<vmem>>, vector<1x1x8x8xf32>,
    %cst_68 = arith.constant dense<0.000000e+00> : vector<8x8xf32>
    %313 = tpu.matmul %309, %223, %cst_68 {dimension_numbers = #tpu.dot_dimension_numbers<[1], [0], [0], [1], [0, 0, 1, 1], [], []>} : vector<8x8xf32>, vector<8x8xf32>, vector<8x8xf32> -> vector<8x8xf32>
    %c8 = arith.constant 8 : index
    %c0_69 = arith.constant 0 : index
    %314 = vector.load %arg11[%c8, %c0_69] : memref<32x32xf32, #tpu.memory_space<vmem>>, vector<8x32xf32>
    %cst_70 = arith.constant dense<0.000000e+00> : vector<8x32xf32>
    %315 = tpu.matmul %313, %314, %cst_70 {dimension_numbers = #tpu.dot_dimension_numbers<[1], [0], [0], [1], [0, 0, 1, 1], [], []>} : vector<8x8xf32>, vector<8x32xf32>, vector<8x32xf32> -> vector<8x32xf32>
    %316 = arith.addf %219, %315 : vector<8x32xf32>
    %317 = vector.extract_strided_slice %39 {offsets = [0, 16], sizes = [8, 8], strides = [1, 1]} : vector<8x32xf32> to vector<8x8xf32>
    %318 = vector.extract_strided_slice %42 {offsets = [0, 16], sizes = [8, 8], strides = [1, 1]} : vector<8x32xf32> to vector<8x8xf32>
    %319 = vector.extract_strided_slice %35 {offsets = [0, 16], sizes = [8, 8], strides = [1, 1]} : vector<8x32xf32> to vector<8x8xf32>
    %320 = vector.extract_strided_slice %36 {offsets = [0, 16], sizes = [8, 8], strides = [1, 1]} : vector<8x32xf32> to vector<8x8xf32>
    %321 = vector.extract_strided_slice %33 {offsets = [0, 16], sizes = [8, 8], strides = [1, 1]} : vector<8x32xf32> to vector<8x8xf32>
    %cst_71 = arith.constant dense<0.000000e+00> : vector<8x8xf32>
    %322 = tpu.matmul %317, %319, %cst_71 {dimension_numbers = #tpu.dot_dimension_numbers<[1], [1], [0], [0], [0, 0, 1, 0], [], []>} : vector<8x8xf32>, vector<8x8xf32>, vector<8x8xf32> -> vector<8x8xf32>
    %cst_72 = arith.constant dense<0.000000e+00> : vector<8x8xf32>
    %323 = tpu.matmul %318, %321, %cst_72 {dimension_numbers = #tpu.dot_dimension_numbers<[1], [1], [0], [0], [0, 0, 1, 0], [], []>} : vector<8x8xf32>, vector<8x8xf32>, vector<8x8xf32> -> vector<8x8xf32>
    %cst_73 = arith.constant dense<0.000000e+00> : vector<8x8xf32>
    %324 = tpu.matmul %121, %323, %cst_73 {dimension_numbers = #tpu.dot_dimension_numbers<[1], [0], [0], [1], [0, 0, 1, 1], [], []>} : vector<8x8xf32>, vector<8x8xf32>, vector<8x8xf32> -> vector<8x8xf32>
    %cst_74 = arith.constant 0.000000e+00 : f32
    %325 = vector.broadcast %cst_74 : f32 to vector<8x8xf32>
    %326 = vector.extract_strided_slice %323 {offsets = [0, 0], sizes = [8, 1], strides = [1, 1]} : vector<8x8xf32> to vector<8x1xf32>
    %327 = vector.broadcast %326 : vector<8x1xf32> to vector<8x8xf32>
    %328 = arith.mulf %327, %56 : vector<8x8xf32>
    %329 = arith.addf %325, %328 : vector<8x8xf32>
    %330 = vector.extract_strided_slice %324 {offsets = [0, 0], sizes = [8, 1], strides = [1, 1]} : vector<8x8xf32> to vector<8x1xf32>
    %331 = vector.broadcast %330 : vector<8x1xf32> to vector<8x8xf32>
    %332 = arith.mulf %331, %88 : vector<8x8xf32>
    %333 = arith.addf %329, %332 : vector<8x8xf32>
    %334 = vector.extract_strided_slice %323 {offsets = [0, 1], sizes = [8, 1], strides = [1, 1]} : vector<8x8xf32> to vector<8x1xf32>
    %335 = vector.broadcast %334 : vector<8x1xf32> to vector<8x8xf32>
    %336 = arith.mulf %335, %60 : vector<8x8xf32>
    %337 = arith.addf %333, %336 : vector<8x8xf32>
    %338 = vector.extract_strided_slice %324 {offsets = [0, 1], sizes = [8, 1], strides = [1, 1]} : vector<8x8xf32> to vector<8x1xf32>
    %339 = vector.broadcast %338 : vector<8x1xf32> to vector<8x8xf32>
    %340 = arith.mulf %339, %92 : vector<8x8xf32>
    %341 = arith.addf %337, %340 : vector<8x8xf32>
    %342 = vector.extract_strided_slice %323 {offsets = [0, 2], sizes = [8, 1], strides = [1, 1]} : vector<8x8xf32> to vector<8x1xf32>
    %343 = vector.broadcast %342 : vector<8x1xf32> to vector<8x8xf32>
    %344 = arith.mulf %343, %64 : vector<8x8xf32>
    %345 = arith.addf %341, %344 : vector<8x8xf32>
    %346 = vector.extract_strided_slice %324 {offsets = [0, 2], sizes = [8, 1], strides = [1, 1]} : vector<8x8xf32> to vector<8x1xf32>
    %347 = vector.broadcast %346 : vector<8x1xf32> to vector<8x8xf32>
    %348 = arith.mulf %347, %96 : vector<8x8xf32>
    %349 = arith.addf %345, %348 : vector<8x8xf32>
    %350 = vector.extract_strided_slice %323 {offsets = [0, 3], sizes = [8, 1], strides = [1, 1]} : vector<8x8xf32> to vector<8x1xf32>
    %351 = vector.broadcast %350 : vector<8x1xf32> to vector<8x8xf32>
    %352 = arith.mulf %351, %68 : vector<8x8xf32>
    %353 = arith.addf %349, %352 : vector<8x8xf32>
    %354 = vector.extract_strided_slice %324 {offsets = [0, 3], sizes = [8, 1], strides = [1, 1]} : vector<8x8xf32> to vector<8x1xf32>
    %355 = vector.broadcast %354 : vector<8x1xf32> to vector<8x8xf32>
    %356 = arith.mulf %355, %100 : vector<8x8xf32>
    %357 = arith.addf %353, %356 : vector<8x8xf32>
    %358 = vector.extract_strided_slice %323 {offsets = [0, 4], sizes = [8, 1], strides = [1, 1]} : vector<8x8xf32> to vector<8x1xf32>
    %359 = vector.broadcast %358 : vector<8x1xf32> to vector<8x8xf32>
    %360 = arith.mulf %359, %72 : vector<8x8xf32>
    %361 = arith.addf %357, %360 : vector<8x8xf32>
    %362 = vector.extract_strided_slice %324 {offsets = [0, 4], sizes = [8, 1], strides = [1, 1]} : vector<8x8xf32> to vector<8x1xf32>
    %363 = vector.broadcast %362 : vector<8x1xf32> to vector<8x8xf32>
    %364 = arith.mulf %363, %104 : vector<8x8xf32>
    %365 = arith.addf %361, %364 : vector<8x8xf32>
    %366 = vector.extract_strided_slice %323 {offsets = [0, 5], sizes = [8, 1], strides = [1, 1]} : vector<8x8xf32> to vector<8x1xf32>
    %367 = vector.broadcast %366 : vector<8x1xf32> to vector<8x8xf32>
    %368 = arith.mulf %367, %76 : vector<8x8xf32>
    %369 = arith.addf %365, %368 : vector<8x8xf32>
    %370 = vector.extract_strided_slice %324 {offsets = [0, 5], sizes = [8, 1], strides = [1, 1]} : vector<8x8xf32> to vector<8x1xf32>
    %371 = vector.broadcast %370 : vector<8x1xf32> to vector<8x8xf32>
    %372 = arith.mulf %371, %108 : vector<8x8xf32>
    %373 = arith.addf %369, %372 : vector<8x8xf32>
    %374 = vector.extract_strided_slice %323 {offsets = [0, 6], sizes = [8, 1], strides = [1, 1]} : vector<8x8xf32> to vector<8x1xf32>
    %375 = vector.broadcast %374 : vector<8x1xf32> to vector<8x8xf32>
    %376 = arith.mulf %375, %80 : vector<8x8xf32>
    %377 = arith.addf %373, %376 : vector<8x8xf32>
    %378 = vector.extract_strided_slice %324 {offsets = [0, 6], sizes = [8, 1], strides = [1, 1]} : vector<8x8xf32> to vector<8x1xf32>
    %379 = vector.broadcast %378 : vector<8x1xf32> to vector<8x8xf32>
    %380 = arith.mulf %379, %112 : vector<8x8xf32>
    %381 = arith.addf %377, %380 : vector<8x8xf32>
    %382 = vector.extract_strided_slice %323 {offsets = [0, 7], sizes = [8, 1], strides = [1, 1]} : vector<8x8xf32> to vector<8x1xf32>
    %383 = vector.broadcast %382 : vector<8x1xf32> to vector<8x8xf32>
    %384 = arith.mulf %383, %84 : vector<8x8xf32>
    %385 = arith.addf %381, %384 : vector<8x8xf32>
    %386 = vector.extract_strided_slice %324 {offsets = [0, 7], sizes = [8, 1], strides = [1, 1]} : vector<8x8xf32> to vector<8x1xf32>
    %387 = vector.broadcast %386 : vector<8x1xf32> to vector<8x8xf32>
    %388 = arith.mulf %387, %116 : vector<8x8xf32>
    %389 = arith.addf %385, %388 : vector<8x8xf32>
    %390 = arith.addf %322, %389 : vector<8x8xf32>
    %cst_75 = arith.constant 0.176776692 : f32
    %391 = vector.broadcast %cst_75 : f32 to vector<8x8xf32>
    %392 = arith.mulf %390, %391 : vector<8x8xf32>
    %c0_i32_76 = arith.constant 0 : i32
    %393 = vector.broadcast %c0_i32_76 : i32 to vector<8x8xi32>
    %394 = arith.cmpi ne, %44, %393 : vector<8x8xi32>
    %cst_77 = arith.constant -1.000000e+09 : f32
    %395 = vector.broadcast %cst_77 : f32 to vector<8x8xf32>
    %396 = arith.select %394, %395, %392 : vector<8x8xi1>, vector<8x8xf32>
    %cst_78 = arith.constant dense<0xFF800000> : vector<8xf32>
    %397 = vector.multi_reduction <maximumf>, %396, %cst_78 [1] : vector<8x8xf32> to vector<8xf32>
    %398 = vector.shape_cast %397 : vector<8xf32> to vector<8x1xf32>
    %399 = vector.broadcast %398 : vector<8x1xf32> to vector<8x8xf32>
    %400 = arith.subf %396, %399 : vector<8x8xf32>
    %401 = math.exp %400 : vector<8x8xf32>
    %cst_79 = arith.constant dense<0.000000e+00> : vector<8xf32>
    %402 = vector.multi_reduction <add>, %401, %cst_79 [1] : vector<8x8xf32> to vector<8xf32>
    %403 = vector.shape_cast %402 : vector<8xf32> to vector<8x1xf32>
    %404 = tpu.reciprocal %403 {approx = true} : vector<8x1xf32> -> vector<8x1xf32>
    %405 = vector.broadcast %404 : vector<8x1xf32> to vector<8x8xf32>
    %406 = arith.mulf %401, %405 : vector<8x8xf32>
    %c0_80 = arith.constant 0 : index
    %c2 = arith.constant 2 : index
    %c0_81 = arith.constant 0 : index
    %c0_82 = arith.constant 0 : index
    %407 = vector.load %arg14[%c0_80, %c2, %c0_81, %c0_82] : memref<1x4x8x8xf32, #tpu.memory_space<vmem>>, vector<1x1x8x8xf32>
    %408 = vector.shape_cast %407 : vector<1x1x8x8xf32> to vector<8x8xf32>
    %409 = vector.shape_cast %406 : vector<8x8xf32> to vector<1x1x8x8xf32>
    tpu.vector_store %arg14[%c0_80, %c2, %c0_81, %c0_82], %409 {strides = array<i32>} : memref<1x4x8x8xf32, #tpu.memory_space<vmem>>, vector<1x1x8x8xf32>,
    %cst_83 = arith.constant dense<0.000000e+00> : vector<8x8xf32>
    %410 = tpu.matmul %406, %320, %cst_83 {dimension_numbers = #tpu.dot_dimension_numbers<[1], [0], [0], [1], [0, 0, 1, 1], [], []>} : vector<8x8xf32>, vector<8x8xf32>, vector<8x8xf32> -> vector<8x8xf32>
    %c16 = arith.constant 16 : index
    %c0_84 = arith.constant 0 : index
    %411 = vector.load %arg11[%c16, %c0_84] : memref<32x32xf32, #tpu.memory_space<vmem>>, vector<8x32xf32>
    %cst_85 = arith.constant dense<0.000000e+00> : vector<8x32xf32>
    %412 = tpu.matmul %410, %411, %cst_85 {dimension_numbers = #tpu.dot_dimension_numbers<[1], [0], [0], [1], [0, 0, 1, 1], [], []>} : vector<8x8xf32>, vector<8x32xf32>, vector<8x32xf32> -> vector<8x32xf32>
    %413 = arith.addf %316, %412 : vector<8x32xf32>
    %414 = vector.extract_strided_slice %39 {offsets = [0, 24], sizes = [8, 8], strides = [1, 1]} : vector<8x32xf32> to vector<8x8xf32>
    %415 = vector.extract_strided_slice %42 {offsets = [0, 24], sizes = [8, 8], strides = [1, 1]} : vector<8x32xf32> to vector<8x8xf32>
    %416 = vector.extract_strided_slice %35 {offsets = [0, 24], sizes = [8, 8], strides = [1, 1]} : vector<8x32xf32> to vector<8x8xf32>
    %417 = vector.extract_strided_slice %36 {offsets = [0, 24], sizes = [8, 8], strides = [1, 1]} : vector<8x32xf32> to vector<8x8xf32>
    %418 = vector.extract_strided_slice %33 {offsets = [0, 24], sizes = [8, 8], strides = [1, 1]} : vector<8x32xf32> to vector<8x8xf32>
    %cst_86 = arith.constant dense<0.000000e+00> : vector<8x8xf32>
    %419 = tpu.matmul %414, %416, %cst_86 {dimension_numbers = #tpu.dot_dimension_numbers<[1], [1], [0], [0], [0, 0, 1, 0], [], []>} : vector<8x8xf32>, vector<8x8xf32>, vector<8x8xf32> -> vector<8x8xf32>
    %cst_87 = arith.constant dense<0.000000e+00> : vector<8x8xf32>
    %420 = tpu.matmul %415, %418, %cst_87 {dimension_numbers = #tpu.dot_dimension_numbers<[1], [1], [0], [0], [0, 0, 1, 0], [], []>} : vector<8x8xf32>, vector<8x8xf32>, vector<8x8xf32> -> vector<8x8xf32>
    %cst_88 = arith.constant dense<0.000000e+00> : vector<8x8xf32>
    %421 = tpu.matmul %121, %420, %cst_88 {dimension_numbers = #tpu.dot_dimension_numbers<[1], [0], [0], [1], [0, 0, 1, 1], [], []>} : vector<8x8xf32>, vector<8x8xf32>, vector<8x8xf32> -> vector<8x8xf32>
    %cst_89 = arith.constant 0.000000e+00 : f32
    %422 = vector.broadcast %cst_89 : f32 to vector<8x8xf32>
    %423 = vector.extract_strided_slice %420 {offsets = [0, 0], sizes = [8, 1], strides = [1, 1]} : vector<8x8xf32> to vector<8x1xf32>
    %424 = vector.broadcast %423 : vector<8x1xf32> to vector<8x8xf32>
    %425 = arith.mulf %424, %56 : vector<8x8xf32>
    %426 = arith.addf %422, %425 : vector<8x8xf32>
    %427 = vector.extract_strided_slice %421 {offsets = [0, 0], sizes = [8, 1], strides = [1, 1]} : vector<8x8xf32> to vector<8x1xf32>
    %428 = vector.broadcast %427 : vector<8x1xf32> to vector<8x8xf32>
    %429 = arith.mulf %428, %88 : vector<8x8xf32>
    %430 = arith.addf %426, %429 : vector<8x8xf32>
    %431 = vector.extract_strided_slice %420 {offsets = [0, 1], sizes = [8, 1], strides = [1, 1]} : vector<8x8xf32> to vector<8x1xf32>
    %432 = vector.broadcast %431 : vector<8x1xf32> to vector<8x8xf32>
    %433 = arith.mulf %432, %60 : vector<8x8xf32>
    %434 = arith.addf %430, %433 : vector<8x8xf32>
    %435 = vector.extract_strided_slice %421 {offsets = [0, 1], sizes = [8, 1], strides = [1, 1]} : vector<8x8xf32> to vector<8x1xf32>
    %436 = vector.broadcast %435 : vector<8x1xf32> to vector<8x8xf32>
    %437 = arith.mulf %436, %92 : vector<8x8xf32>
    %438 = arith.addf %434, %437 : vector<8x8xf32>
    %439 = vector.extract_strided_slice %420 {offsets = [0, 2], sizes = [8, 1], strides = [1, 1]} : vector<8x8xf32> to vector<8x1xf32>
    %440 = vector.broadcast %439 : vector<8x1xf32> to vector<8x8xf32>
    %441 = arith.mulf %440, %64 : vector<8x8xf32>
    %442 = arith.addf %438, %441 : vector<8x8xf32>
    %443 = vector.extract_strided_slice %421 {offsets = [0, 2], sizes = [8, 1], strides = [1, 1]} : vector<8x8xf32> to vector<8x1xf32>
    %444 = vector.broadcast %443 : vector<8x1xf32> to vector<8x8xf32>
    %445 = arith.mulf %444, %96 : vector<8x8xf32>
    %446 = arith.addf %442, %445 : vector<8x8xf32>
    %447 = vector.extract_strided_slice %420 {offsets = [0, 3], sizes = [8, 1], strides = [1, 1]} : vector<8x8xf32> to vector<8x1xf32>
    %448 = vector.broadcast %447 : vector<8x1xf32> to vector<8x8xf32>
    %449 = arith.mulf %448, %68 : vector<8x8xf32>
    %450 = arith.addf %446, %449 : vector<8x8xf32>
    %451 = vector.extract_strided_slice %421 {offsets = [0, 3], sizes = [8, 1], strides = [1, 1]} : vector<8x8xf32> to vector<8x1xf32>
    %452 = vector.broadcast %451 : vector<8x1xf32> to vector<8x8xf32>
    %453 = arith.mulf %452, %100 : vector<8x8xf32>
    %454 = arith.addf %450, %453 : vector<8x8xf32>
    %455 = vector.extract_strided_slice %420 {offsets = [0, 4], sizes = [8, 1], strides = [1, 1]} : vector<8x8xf32> to vector<8x1xf32>
    %456 = vector.broadcast %455 : vector<8x1xf32> to vector<8x8xf32>
    %457 = arith.mulf %456, %72 : vector<8x8xf32>
    %458 = arith.addf %454, %457 : vector<8x8xf32>
    %459 = vector.extract_strided_slice %421 {offsets = [0, 4], sizes = [8, 1], strides = [1, 1]} : vector<8x8xf32> to vector<8x1xf32>
    %460 = vector.broadcast %459 : vector<8x1xf32> to vector<8x8xf32>
    %461 = arith.mulf %460, %104 : vector<8x8xf32>
    %462 = arith.addf %458, %461 : vector<8x8xf32>
    %463 = vector.extract_strided_slice %420 {offsets = [0, 5], sizes = [8, 1], strides = [1, 1]} : vector<8x8xf32> to vector<8x1xf32>
    %464 = vector.broadcast %463 : vector<8x1xf32> to vector<8x8xf32>
    %465 = arith.mulf %464, %76 : vector<8x8xf32>
    %466 = arith.addf %462, %465 : vector<8x8xf32>
    %467 = vector.extract_strided_slice %421 {offsets = [0, 5], sizes = [8, 1], strides = [1, 1]} : vector<8x8xf32> to vector<8x1xf32>
    %468 = vector.broadcast %467 : vector<8x1xf32> to vector<8x8xf32>
    %469 = arith.mulf %468, %108 : vector<8x8xf32>
    %470 = arith.addf %466, %469 : vector<8x8xf32>
    %471 = vector.extract_strided_slice %420 {offsets = [0, 6], sizes = [8, 1], strides = [1, 1]} : vector<8x8xf32> to vector<8x1xf32>
    %472 = vector.broadcast %471 : vector<8x1xf32> to vector<8x8xf32>
    %473 = arith.mulf %472, %80 : vector<8x8xf32>
    %474 = arith.addf %470, %473 : vector<8x8xf32>
    %475 = vector.extract_strided_slice %421 {offsets = [0, 6], sizes = [8, 1], strides = [1, 1]} : vector<8x8xf32> to vector<8x1xf32>
    %476 = vector.broadcast %475 : vector<8x1xf32> to vector<8x8xf32>
    %477 = arith.mulf %476, %112 : vector<8x8xf32>
    %478 = arith.addf %474, %477 : vector<8x8xf32>
    %479 = vector.extract_strided_slice %420 {offsets = [0, 7], sizes = [8, 1], strides = [1, 1]} : vector<8x8xf32> to vector<8x1xf32>
    %480 = vector.broadcast %479 : vector<8x1xf32> to vector<8x8xf32>
    %481 = arith.mulf %480, %84 : vector<8x8xf32>
    %482 = arith.addf %478, %481 : vector<8x8xf32>
    %483 = vector.extract_strided_slice %421 {offsets = [0, 7], sizes = [8, 1], strides = [1, 1]} : vector<8x8xf32> to vector<8x1xf32>
    %484 = vector.broadcast %483 : vector<8x1xf32> to vector<8x8xf32>
    %485 = arith.mulf %484, %116 : vector<8x8xf32>
    %486 = arith.addf %482, %485 : vector<8x8xf32>
    %487 = arith.addf %419, %486 : vector<8x8xf32>
    %cst_90 = arith.constant 0.176776692 : f32
    %488 = vector.broadcast %cst_90 : f32 to vector<8x8xf32>
    %489 = arith.mulf %487, %488 : vector<8x8xf32>
    %c0_i32_91 = arith.constant 0 : i32
    %490 = vector.broadcast %c0_i32_91 : i32 to vector<8x8xi32>
    %491 = arith.cmpi ne, %44, %490 : vector<8x8xi32>
    %cst_92 = arith.constant -1.000000e+09 : f32
    %492 = vector.broadcast %cst_92 : f32 to vector<8x8xf32>
    %493 = arith.select %491, %492, %489 : vector<8x8xi1>, vector<8x8xf32>
    %cst_93 = arith.constant dense<0xFF800000> : vector<8xf32>
    %494 = vector.multi_reduction <maximumf>, %493, %cst_93 [1] : vector<8x8xf32> to vector<8xf32>
    %495 = vector.shape_cast %494 : vector<8xf32> to vector<8x1xf32>
    %496 = vector.broadcast %495 : vector<8x1xf32> to vector<8x8xf32>
    %497 = arith.subf %493, %496 : vector<8x8xf32>
    %498 = math.exp %497 : vector<8x8xf32>
    %cst_94 = arith.constant dense<0.000000e+00> : vector<8xf32>
    %499 = vector.multi_reduction <add>, %498, %cst_94 [1] : vector<8x8xf32> to vector<8xf32>
    %500 = vector.shape_cast %499 : vector<8xf32> to vector<8x1xf32>
    %501 = tpu.reciprocal %500 {approx = true} : vector<8x1xf32> -> vector<8x1xf32>
    %502 = vector.broadcast %501 : vector<8x1xf32> to vector<8x8xf32>
    %503 = arith.mulf %498, %502 : vector<8x8xf32>
    %c0_95 = arith.constant 0 : index
    %c3 = arith.constant 3 : index
    %c0_96 = arith.constant 0 : index
    %c0_97 = arith.constant 0 : index
    %504 = vector.load %arg14[%c0_95, %c3, %c0_96, %c0_97] : memref<1x4x8x8xf32, #tpu.memory_space<vmem>>, vector<1x1x8x8xf32>
    %505 = vector.shape_cast %504 : vector<1x1x8x8xf32> to vector<8x8xf32>
    %506 = vector.shape_cast %503 : vector<8x8xf32> to vector<1x1x8x8xf32>
    tpu.vector_store %arg14[%c0_95, %c3, %c0_96, %c0_97], %506 {strides = array<i32>} : memref<1x4x8x8xf32, #tpu.memory_space<vmem>>, vector<1x1x8x8xf32>,
    %cst_98 = arith.constant dense<0.000000e+00> : vector<8x8xf32>
    %507 = tpu.matmul %503, %417, %cst_98 {dimension_numbers = #tpu.dot_dimension_numbers<[1], [0], [0], [1], [0, 0, 1, 1], [], []>} : vector<8x8xf32>, vector<8x8xf32>, vector<8x8xf32> -> vector<8x8xf32>
    %c24 = arith.constant 24 : index
    %c0_99 = arith.constant 0 : index
    %508 = vector.load %arg11[%c24, %c0_99] : memref<32x32xf32, #tpu.memory_space<vmem>>, vector<8x32xf32>
    %cst_100 = arith.constant dense<0.000000e+00> : vector<8x32xf32>
    %509 = tpu.matmul %507, %508, %cst_100 {dimension_numbers = #tpu.dot_dimension_numbers<[1], [0], [0], [1], [0, 0, 1, 1], [], []>} : vector<8x8xf32>, vector<8x32xf32>, vector<8x32xf32> -> vector<8x32xf32>
    %510 = arith.addf %413, %509 : vector<8x32xf32>
    %c0_101 = arith.constant 0 : index
    %c0_102 = arith.constant 0 : index
    %511 = vector.load %arg12[%c0_101, %c0_102] : memref<1x32xf32, #tpu.memory_space<vmem>>, vector<1x32xf32>
    %512 = vector.broadcast %511 : vector<1x32xf32> to vector<8x32xf32>
    %513 = arith.addf %510, %512 : vector<8x32xf32>
    %514 = arith.addf %513, %1 : vector<8x32xf32>
    %c0_103 = arith.constant 0 : index
    %c0_104 = arith.constant 0 : index
    %c0_105 = arith.constant 0 : index
    %515 = vector.load %arg13[%c0_103, %c0_104, %c0_105] : memref<1x8x32xf32, #tpu.memory_space<vmem>>, vector<1x8x32xf32>
    %516 = vector.shape_cast %515 : vector<1x8x32xf32> to vector<8x32xf32>
    %517 = vector.shape_cast %514 : vector<8x32xf32> to vector<1x8x32xf32>
    tpu.vector_store %arg13[%c0_103, %c0_104, %c0_105], %517 {strides = array<i32>} : memref<1x8x32xf32, #tpu.memory_space<vmem>>, vector<1x8x32xf32>,
    return
  }
  func.func @transform_0(%arg0: i32) -> (i32, i32, i32) {
    %c0_i32 = arith.constant 0 : i32
    %c0_i32_0 = arith.constant 0 : i32
    %c0_i32_1 = arith.constant 0 : i32
    return %arg0, %c0_i32, %c0_i32_0 : i32, i32, i32
  }
  func.func @transform_1(%arg0: i32) -> (i32, i32) {
    %c0_i32 = arith.constant 0 : i32
    %c0_i32_0 = arith.constant 0 : i32
    %c0_i32_1 = arith.constant 0 : i32
    return %c0_i32, %c0_i32_0 : i32, i32
  }
  func.func @transform_2(%arg0: i32) -> (i32, i32) {
    %c0_i32 = arith.constant 0 : i32
    %c0_i32_0 = arith.constant 0 : i32
    %c0_i32_1 = arith.constant 0 : i32
    return %c0_i32, %c0_i32_0 : i32, i32
  }
  func.func @transform_3(%arg0: i32) -> (i32, i32) {
    %c0_i32 = arith.constant 0 : i32
    %c0_i32_0 = arith.constant 0 : i32
    %c0_i32_1 = arith.constant 0 : i32
    return %c0_i32, %c0_i32_0 : i32, i32
  }
  func.func @transform_4(%arg0: i32) -> (i32, i32, i32) {
    %c0_i32 = arith.constant 0 : i32
    %c0_i32_0 = arith.constant 0 : i32
    %c0_i32_1 = arith.constant 0 : i32
    return %arg0, %c0_i32, %c0_i32_0 : i32, i32, i32
  }
  func.func @transform_5(%arg0: i32) -> (i32, i32) {
    %c0_i32 = arith.constant 0 : i32
    %c0_i32_0 = arith.constant 0 : i32
    %c0_i32_1 = arith.constant 0 : i32
    return %c0_i32, %c0_i32_0 : i32, i32
  }
  func.func @transform_6(%arg0: i32) -> (i32, i32) {
    %c0_i32 = arith.constant 0 : i32
    %c0_i32_0 = arith.constant 0 : i32
    %c0_i32_1 = arith.constant 0 : i32
    return %c0_i32, %c0_i32_0 : i32, i32
  }
  func.func @transform_7(%arg0: i32) -> (i32, i32) {
    %c0_i32 = arith.constant 0 : i32
    %c0_i32_0 = arith.constant 0 : i32
    %c0_i32_1 = arith.constant 0 : i32
    return %c0_i32, %c0_i32_0 : i32, i32
  }
  func.func @transform_8(%arg0: i32) -> (i32, i32) {
    %c0_i32 = arith.constant 0 : i32
    %c0_i32_0 = arith.constant 0 : i32
    %c0_i32_1 = arith.constant 0 : i32
    return %c0_i32, %c0_i32_0 : i32, i32
  }
  func.func @transform_9(%arg0: i32) -> (i32, i32) {
    %c0_i32 = arith.constant 0 : i32
    %c0_i32_0 = arith.constant 0 : i32
    %c0_i32_1 = arith.constant 0 : i32
    return %c0_i32, %c0_i32_0 : i32, i32
  }
  func.func @transform_10(%arg0: i32) -> (i32, i32) {
    %c0_i32 = arith.constant 0 : i32
    %c0_i32_0 = arith.constant 0 : i32
    %c0_i32_1 = arith.constant 0 : i32
    return %c0_i32, %c0_i32_0 : i32, i32
  }
  func.func @transform_11(%arg0: i32) -> (i32, i32) {
    %c0_i32 = arith.constant 0 : i32
    %c0_i32_0 = arith.constant 0 : i32
    %c0_i32_1 = arith.constant 0 : i32
    return %c0_i32, %c0_i32_0 : i32, i32
  }
  func.func @transform_12(%arg0: i32) -> (i32, i32, i32) {
    %c0_i32 = arith.constant 0 : i32
    %c0_i32_0 = arith.constant 0 : i32
    %c0_i32_1 = arith.constant 0 : i32
    return %arg0, %c0_i32, %c0_i32_0 : i32, i32, i32
  }
  func.func @transform_13(%arg0: i32) -> (i32, i32, i32, i32) {
    %c0_i32 = arith.constant 0 : i32
    %c0_i32_0 = arith.constant 0 : i32
    %c0_i32_1 = arith.constant 0 : i32
    %c0_i32_2 = arith.constant 0 : i32
    return %arg0, %c0_i32, %c0_i32_0, %c0_i32_1 : i32, i32, i32, i32
  }
}

</mosaic_0001>

<bundles_post_ra>
// kernel: tpu_custom_call.1
= control target key start
LH: loop header
LB: loop body
LE: loop exit
PB: predicated region body
PF: predicated region fallthrough
CT: control target
= control target key end

     0   :  { %s4286_s0 = inlined_call_operand.hbm [shape: f32[2,8,32], index: 0, kind: input, shape index: {}]   ;;  %s4287_s1 = inlined_call_operand.vmem [shape: f32[64,32], index: 1, kind: input, shape index: {}]   ;;  %s4288_s2 = inlined_call_operand.vmem [shape: f32[1,32], index: 2, kind: input, shape index: {}]   ;;  %s4289_s3 = inlined_call_operand.vmem [shape: f32[1,32], index: 3, kind: input, shape index: {}]   ;;  %s4290_s4 = inlined_call_operand.hbm [shape: s32[2,8,8], index: 4, kind: input, shape index: {}]   ;;  %s4291_s5 = inlined_call_operand.vmem [shape: f32[32,96], index: 5, kind: input, shape index: {}]   ;;  %s4292_s6 = inlined_call_operand.vmem [shape: f32[1,96], index: 6, kind: input, shape index: {}]   ;;  %s4293_s7 = inlined_call_operand.vmem [shape: f32[32,32], index: 7, kind: input, shape index: {}]   ;;  %s4294_s8 = inlined_call_operand.vmem [shape: f32[1,32], index: 8, kind: input, shape index: {}]   ;;  %s4295_s9 = inlined_call_operand.vmem [shape: f32[1,32], index: 9, kind: input, shape index: {}]   ;;  %s4296_s10 = inlined_call_operand.vmem [shape: f32[32,32], index: 10, kind: input, shape index: {}]   ;;  %s4297_s11 = inlined_call_operand.vmem [shape: f32[1,32], index: 11, kind: input, shape index: {}]   ;;  %s4298_s12 = inlined_call_operand.hbm [shape: f32[2,8,32], index: 12, kind: output, shape index: {0}]   ;;  %s4299_s13 = inlined_call_operand.hbm [shape: f32[2,4,8,8], index: 13, kind: output, shape index: {1}]  }
   0x1   :  { %4310 = sst [smem:[#allocation19_spill]] %s4286_s0 }
   0x2   :  { %4311 = sst [smem:[#allocation20_spill]] %s4287_s1 }
   0x3   :  { %4312 = sst [smem:[#allocation21_spill]] %s4298_s12 }
   0x4   :  { %19 = vsyncpa [#allocation3], 0 }
   0x5   :  { %21 = vsyncpa [#allocation3 + $0x1], 0 }
   0x6   :  { %22 = vsyncpa [#allocation6], 0 }
   0x7   :  { %24 = vsyncpa [#allocation6 + $0x1], 0 }
   0x8   :  { %25 = vsyncpa [#allocation4], 0 }
   0x9   :  { %27 = vsyncpa [#allocation4 + $0x1], 0 }
   0xa   :  { %28 = vsyncpa [#allocation9], 0 }
   0xb   :  { %30 = vsyncpa [#allocation9 + $0x1], 0  ;;  %s3577_s25 = smov 0   ;;  %s3579_s26 = smov 0  }
   0xc   :  { %s3581_s27 = smov 0   ;;  %s3583_s28 = smov 0  }
   0xd LB: > { %4313 = sst [smem:[#allocation14_spill]] %s3466_s25  ;;  %s3598_s29 = sadd.s32 4294967295, %s3478_s28   ;;  %s3478_s28 = sphi %s3583_s28, %s4338_s28   ;;  %s3474_s27 = sphi %s3581_s27, %s4340_s27   ;;  %s3470_s26 = sphi %s3579_s26, %s4342_s26   ;;  %s3466_s25 = sphi %s3577_s25, %s4341_s25  }
   0xe   : > { %4314 = sst [smem:[#allocation15_spill]] %s3474_s27  ;;  %s2913_s30 = sadd.s32 4294967294, %s3478_s28  }
   0xf   : > { %s3602_s14 = sadd.s32 1, %s3478_s28   ;;  %s43_s15 = sadd.s32 1, %s3474_s27 }
  0x10   : > { %4315 = sst [smem:[#allocation16_spill]] %s3602_s14  ;;  %s40_s16 = ssub.s32 %s3478_s28, %s3602_s14 }
  0x11   : > { %p50_p0 = scmp.ne.s32.totalorder %s3474_s27, %s3470_s26  ;;  %p41_p1 = scmp.eq.s32.totalorder %s40_s16, 0 }
  0x12   : > { %p51_p2 = scmp.eq.s32.totalorder %s3478_s28, 0  ;;  %p56_p3 = scmp.ne.s32.totalorder %s3470_s26, %s3466_s25 }
  0x13   : > { %p57_p4 = scmp.eq.s32.totalorder %s3598_s29, 0  ;;  %p316_p7 = scmp.eq.s32.totalorder %s3598_s29, 1 }
  0x14   : > { %s3614_s17 = scalar_select %p41_p1, %s3474_s27, %s43_s15  }
  0x15   : > { %p3616_p5 = por %p51_p2, %p50_p0  ;;  %p3620_p6 = por %p57_p4, %p56_p3 }
  0x16   : > { %4316 = sst [smem:[#allocation17_spill]] %s3614_s17  ;;  %p322_p8 = scmp.eq.s32.totalorder %s2913_s30, 1 }
  0x17   : > { %s4318_s19 = scalar_select %p3620_p6, 1, 0 }
  0x18   : > { %p3184_p10 = scmp.lt.s32.totalorder %s3478_s28, 2  ;;  %p3627_p11 = por %p316_p7, %p50_p0 }
  0x19   : > { %p3631_p12 = por %p322_p8, %p56_p3  ;;  %s3636_s22 = sand.u32 1, %s3474_s27  }
  0x1a   : > { %s4319_s20 = scalar_select %p3627_p11, 1, 0 }
  0x1b   : > { %s4320_s21 = scalar_select %p3631_p12, 1, 0 }
  0x1c   : > { %s4304_s23 = sshll.u32 %s3478_s28, 7  ;;  %s4303_s24 = sshll.u32 %s3636_s22, 3 }
  0x1d   : > { %4321 = sst [smem:[#allocation18_spill]] %s4320_s21  ;;  %s402_s17 = scalar_lea.vmem [#allocation2], %s4303_s24 }
  0x1e   : > { %s4322_s0 = sld [smem:[#allocation19_spill]]  ;;  %s409_s14 = sshll.u32 %s402_s17, 4  ;;  %s3655_s14 = int_to_ptr.vmem [resolvable:$true] %s409_s14 }
  0x1f   : > { %p3651_p13 = pnand %p3184_p10, %p3616_p5  ;;  %s399_s15 = scalar_lea.sflag [#allocation3], %s3636_s22 }
  0x21   : > { %p3326_p3 = pneg %p3651_p13 }
  0x24   : > { %s3645_s16 = scalar_lea.hbm %s4322_s0, %s4304_s23  ;;  %s3329_s24 = scalar_lea.hbm %s4322_s0, 256 }
  0x25   : > { %s3324_s30 = scalar_lea.hbm %s3645_s16, 128  ;;  %p3330_p5 = scmp.lt.s32.totalorder %s3645_s16, %s4322_s0 }
  0x26   : > { %p3325_p2 = scmp.ne.s32.totalorder %s3645_s16, %s3324_s30  ;;  %p3331_p8 = scmp.lt.s32.totalorder %s3329_s24, %s3324_s30 }
  0x28   : > { %p3327_p4 = pnand %p3326_p3, %p3325_p2  ;;  %p3332_p10 = por %p3331_p8, %p3330_p5 }
  0x2a   : > { %p3328_p7 = pneg %p3327_p4 }
  0x2c   : > { %p3333_p9 = pnand %p3332_p10, %p3328_p7 }
  0x2e   : > { %3336 = shalt.err (!%p3333_p9)
}
  0x2f   : > { %s3337_s25 = scalar_lea.vmem %s3655_s14, 128  ;;  %s3480_s17 = smov [#allocation2]  }
  0x30   : > { %p3338_p0 = scmp.ne.s32.totalorder %s3655_s14, %s3337_s25  ;;  %s3342_s18 = sshll.u32 %s3480_s17, 4  ;;  %s3343_s18 = int_to_ptr.vmem [resolvable:$false] %s3342_s18 }
  0x31   : > { %s3344_s12 = scalar_lea.vmem %s3343_s18, 256  ;;  %p3345_p1 = scmp.lt.s32.totalorder %s3655_s14, %s3343_s18 }
  0x32   : > { %p3340_p2 = pnand %p3338_p0, %p3326_p3  ;;  %p3346_p12 = scmp.lt.s32.totalorder %s3344_s12, %s3337_s25 }
  0x34   : > { %p3341_p4 = pneg %p3340_p2  ;;  %p3347_p11 = por %p3346_p12, %p3345_p1 }
  0x36   : > { %p3348_p5 = pnand %p3347_p11, %p3341_p4 }
  0x38   : > { %3351 = shalt.err (!%p3348_p5)
}
  0x39   : > { %3173 = dma.hbm_to_vmem [thread:$0]  (!%p3651_p13), %s3645_s16, 128, %s3655_s14, %s399_s15  }
  0x3a   : > { %p4324_p9 = scmp.lt.s32.totalorder %s3478_s28, 3  ;;  %p4325_p0 = scmp.ge.s32.totalorder %s3478_s28, 1 }
  0x3b   : > { %s4327_s12 = sshll.u32 %s3478_s28, 7  ;;  %s4328_s30 = sshll.u32 %s3636_s22, 3 }
  0x3c   : > { %p3688_p7 = pnand %p4325_p0, %p4324_p9  ;;  %s3697_s24 = scalar_lea.hbm %s4290_s4, %s4327_s12 }
  0x3d   : > { %s420_s17 = scalar_lea.vmem [#allocation5], %s4328_s30  ;;  %s417_s14 = scalar_lea.sflag [#allocation6], %s3636_s22 }
  0x3e   : > { %s4326_s21 = scalar_select %p3688_p7, 1, 0 }
  0x3f   : > { %s427_s18 = sshll.u32 %s420_s17, 4  ;;  %s3352_s16 = scalar_lea.hbm %s3697_s24, 128  ;;  %s428_s18 = int_to_ptr.vmem [resolvable:$true] %s427_s18 }
  0x40   : > { %p3353_p11 = scmp.ne.s32.totalorder %s3697_s24, %s3352_s16  ;;  %s3357_s25 = scalar_lea.hbm %s4290_s4, 256 }
  0x41   : > { %p3358_p8 = scmp.lt.s32.totalorder %s3697_s24, %s4290_s4  ;;  %p3359_p10 = scmp.lt.s32.totalorder %s3357_s25, %s3352_s16 }
  0x42   : > { %p3355_p12 = pnand %p3353_p11, %p3326_p3 }
  0x43   : > { %p3360_p2 = por %p3359_p10, %p3358_p8 }
  0x44   : > { %p3356_p1 = pneg %p3355_p12 }
  0x46   : > { %p3361_p4 = pnand %p3360_p2, %p3356_p1 }
  0x48   : > { %3364 = shalt.err (!%p3361_p4)
}
  0x49   : > { %s3365_s30 = scalar_lea.vmem %s428_s18, 128  ;;  %s3481_s22 = smov [#allocation5]  }
  0x4a   : > { %p3366_p5 = scmp.ne.s32.totalorder %s428_s18, %s3365_s30  ;;  %s3370_s17 = sshll.u32 %s3481_s22, 4  ;;  %s3371_s17 = int_to_ptr.vmem [resolvable:$false] %s3370_s17 }
  0x4b   : > { %s3372_s0 = scalar_lea.vmem %s3371_s17, 256  ;;  %p3373_p11 = scmp.lt.s32.totalorder %s428_s18, %s3371_s17 }
  0x4c   : > { %p3368_p9 = pnand %p3366_p5, %p3326_p3  ;;  %p3374_p12 = scmp.lt.s32.totalorder %s3372_s0, %s3365_s30 }
  0x4e   : > { %p3369_p0 = pneg %p3368_p9  ;;  %p3375_p6 = por %p3374_p12, %p3373_p11 }
  0x50   : > { %p3376_p7 = pnand %p3375_p6, %p3369_p0 }
  0x52   : > { %3379 = shalt.err (!%p3376_p7)
}
  0x53   : > { %3176 = dma.hbm_to_vmem [thread:$0]  (!%p3651_p13), %s3697_s24, 128, %s428_s18, %s417_s14  }
  0x54   : > { %p4329_p1 = scmp.ne.s32.totalorder %s4326_s21, 0 }
  0x55   : > { %s3723_s16 = sand.u32 (!%p4329_p1), 1, %s3470_s26   ;;  %p4330_p6 = scmp.ne.s32.totalorder (!%p4329_p1), %s4318_s19, 0 }
  0x56   : > { %436 = sbr.rel (%p4329_p1) target bundleno = 4486 (0x1186), region = 68  ;;  %s3726_s15 = sshll.u32 (!%p4329_p1), %s3723_s16, 3 }
  0x57   : > { %s439_s25 = scalar_lea.sflag (!%p4329_p1), [#allocation3], %s3723_s16  ;;  %s442_s12 = scalar_lea.vmem (!%p4329_p1), [#allocation2], %s3726_s15 }
  0x5b   : > { %3449 = dma.done.wait (%p4330_p6), %s439_s25, 128  }
  0x5c   : > { %3451 = vsyncadd (%p4330_p6), %s439_s25, 4294967168  ;;  %s448_s27 = scalar_lea.sflag [#allocation6], %s3723_s16  ;;  %s451_s21 = scalar_lea.vmem [#allocation5], %s3726_s15 }
  0x5d   : > { %3453 = dma.done.wait (%p4330_p6), %s448_s27, 128  }
  0x5e   : > { %3455 = vsyncadd (%p4330_p6), %s448_s27, 4294967168  ;;  %vm505_vm0 = vcmask 261120   ;;  %v504_v0 = vld [vmem:[%s442_s12] sm:$0xff]  ;;  %v632_v7 = vld [vmem:[%s4293_s7 + $0x18] sm:$0xff]  ;;  %v3482_v9 = vmov 0.0   ;;  %s4331_s1 = sld [smem:[#allocation20_spill]]  ;;  %v723_v40 = vlaneseq }
  0x5f   : > { %v506_v1 = vsel %vm505_vm0, %v504_v0, 0.0  ;;  %v547_v8 = vld [vmem:[%s4291_s5 + $0x18] sm:$0xff]  ;;  %3051 = vmatprep.subr.mxu1 %v3482_v9  ;;  %3040 = vmatprep.subr.mxu0 %v3482_v9  ;;  %v631_v10 = vld [vmem:[%s4293_s7 + $0x10] sm:$0xff]  ;;  %v630_v12 = vld [vmem:[%s4293_s7 + $0x8] sm:$0xff]  ;;  %vm3483_vm1 = vmmov 0   ;;  %vm783_vm4 = vcmask 64512  }
  0x60   : > { %507 = vadd.xlane.f32.xlu0 %v506_v1  ;;  %v546_v11 = vld [vmem:[%s4291_s5 + $0x10] sm:$0xff]  ;;  %3052 = vmatpush3.msra.mxu1 %v632_v7  ;;  %v545_v13 = vld [vmem:[%s4291_s5 + $0x8] sm:$0xff]  ;;  %v629_v14 = vld [vmem:[%s4293_s7] sm:$0xff]  ;;  %v3484_v33 = vmov 0   ;;  %s3485_s23 = smov 96   ;;  %v3820_v41 = vshrl.u32 %v723_v40, 7 }
  0x61   : > { %3041 = vmatpush3.msra.mxu0 %v547_v8  ;;  %3053 = vmatprep.subr.mxu1 %v3482_v9  ;;  %v544_v15 = vld [vmem:[%s4291_s5] sm:$0xff]  ;;  %v3822_v42 = vand.u32 127, %v723_v40  ;;  %v3486_v53 = vmov 1   ;;  %v3487_v54 = vmov 2   ;;  %v3488_v55 = vmov 3   ;;  %s3492_s17 = smov 120  }
  0x62   : > { %3042 = vmatprep.subr.mxu0 %v3482_v9  ;;  %3054 = vmatpush3.msra.mxu1 %v631_v10  ;;  %v2925_v26 = vld [vmem:[%s4288_s2] ss:$0 sm:$0xff]  ;;  %v779_v49 = vadd.s32 1, %v3820_v41  ;;  %v3489_v56 = vmov 4   ;;  %v3490_v57 = vmov 5   ;;  %v3491_v58 = vmov 6  }
  0x63   : > { %3043 = vmatpush3.msra.mxu0 %v546_v11  ;;  %3055 = vmatprep.subr.mxu1 %v3482_v9  ;;  %v2926_v28 = vld [vmem:[%s4289_s3] ss:$0 sm:$0xff]  ;;  %v727_v43 = vadd.s32 7, %v3822_v42  ;;  %v729_v44 = vsub.s32 %v3822_v42, %v3820_v41  ;;  %v3493_v7 = vmov 7   ;;  %s3494_s0 = smov 88   ;;  %s2924_s25 = sshll.u32 %s3723_s16, 5 }
  0x64   : > { %3044 = vmatprep.subr.mxu0 %v3482_v9  ;;  %3056 = vmatpush3.msra.mxu1 %v630_v12  ;;  %v628_v16 = vld [vmem:[%s4331_s1] sm:$0xff]  ;;  %vm780_vm5 = vcmp.eq.s32.totalorder %v3822_v42, %v779_v49  ;;  %s3998_s27 = scalar_lea.vmem [#allocation8], %s2924_s25  ;;  %s3496_s24 = smov 56  }
  0x65   : > { %3045 = vmatpush3.msra.mxu0 %v545_v13  ;;  %3057 = vmatprep.subr.mxu1 %v3482_v9  ;;  %v2927_v34 = vld [vmem:[%s4292_s6] ss:$0 sm:$0xff]  ;;  %v3828_v45 = vsub.s32 %v727_v43, %v3820_v41  ;;  %v3845_v50 = vsel %vm780_vm5, 1.0, %v3482_v9  ;;  %v3885_v8 = vadd.s32 4294967294, %v729_v44  ;;  %s3497_s18 = smov 112   ;;  %s3498_s19 = smov 80  }
  0x66   : > { %3046 = vmatprep.subr.mxu0 %v3482_v9  ;;  %3058 = vmatpush3.msra.mxu1 %v629_v14  ;;  %v2931_v36 = vld [vmem:[%s4295_s9] ss:$0 sm:$0xff]  ;;  %s2785_s30 = sshll.u32 %s3998_s27, 4  ;;  %p4332_p3 = scmp.ne.s32.totalorder %s4319_s20, 0  ;;  %s4218_s30 = int_to_ptr.vmem [resolvable:$true] %s2785_s30 }
  0x67   : > { %3059 = vmatprep.mubr.msk.f32.mxu1 %vm3483_vm1, %v3482_v9  ;;  %3047 = vmatpush3.msra.mxu0 %v544_v15  ;;  %v2930_v46 = vld [vmem:[%s4294_s8] ss:$0 sm:$0xff]  ;;  %vm731_vm6 = vcmp.eq.s32.totalorder %v3828_v45, 0  ;;  %vm755_vm7 = vcmp.eq.s32.totalorder %v3885_v8, 0  ;;  %vm734_vm8 = vcmp.eq.s32.totalorder %v3828_v45, 1  ;;  %vm758_vm9 = vcmp.eq.s32.totalorder %v3885_v8, 1 }
  0x68   : > { %3048 = vmatprep.mubr.msk.f32.mxu0 %vm3483_vm1, %v3482_v9  ;;  %3060 = vmatmul.mubr.msk.f32.vlgmr.msra.gmra.mxu1 %vm505_vm0, %v628_v16  ;;  %v3891_v10 = vsel %vm731_vm6, 1.0, %v3482_v9  ;;  %v3894_v11 = vsel %vm755_vm7, 1.0, %v3482_v9  ;;  %v3898_v12 = vsel %vm734_vm8, 1.0, %v3482_v9  ;;  %vm737_vm10 = vcmp.eq.s32.totalorder %v3828_v45, 2  ;;  %s3380_s25 = scalar_lea.vmem %s4218_s30, 512 }
  0x69   : > { %3062 = vmatprep.subr.mxu0 %v3482_v9  ;;  %3067 = vmatprep.subr.mxu1 %v3482_v9  ;;  %vm761_vm11 = vcmp.eq.s32.totalorder %v3885_v8, 2  ;;  %vm740_vm12 = vcmp.eq.s32.totalorder %v3828_v45, 3  ;;  %vm764_vm13 = vcmp.eq.s32.totalorder %v3885_v8, 3  ;;  %vm743_vm14 = vcmp.eq.s32.totalorder %v3828_v45, 4  ;;  %p3381_p13 = scmp.ne.s32.totalorder %s4218_s30, %s3380_s25 }
  0x6a   : > { %3069 = vmatprep.mubr.msk.f32.mxu1 %vm3483_vm1, %v3482_v9  ;;  %3241 = vset.pattern.permute.xlu1 %v3484_v33  ;;  %vm767_vm15 = vcmp.eq.s32.totalorder %v3885_v8, 4  ;;  %vm749_vm5 = vcmp.eq.s32.totalorder %v3828_v45, 6  ;;  %vm773_vm6 = vcmp.eq.s32.totalorder %v3885_v8, 6  ;;  %vm752_vm7 = vcmp.eq.s32.totalorder %v3828_v45, 7 }
  0x6b   : > { %3242 = vset.pattern.permute.xlu0 %v3484_v33  ;;  %v3934_v41 = vsel %vm767_vm15, 1.0, %v3482_v9  ;;  %vm776_vm8 = vcmp.eq.s32.totalorder %v3885_v8, 7  ;;  %p3382_p7 = pnand %p3381_p13, %p4332_p3 }
  0x6d   : > { %p3383_p8 = pneg %p3382_p7 }
  0xe9   : > { %v508_v2 = vpop.xlane.xlu0 %507 }
  0xea   : > { %v510_v3 = vmul.f32 0.03125, %v508_v2 }
  0xec   : > { %v511_v4 = vsub.f32 %v504_v0, %v510_v3 }
  0xee   : > { %v512_v5 = vmul.f32 %v511_v4, %v511_v4 }
  0xf0   : > { %v513_v6 = vsel %vm505_vm0, %v512_v5, 0.0 }
  0xf1   : > { %514 = vadd.xlane.f32.xlu0 %v513_v6 }
 0x128   : > { %v3797_v31 = vpop.f32.mrf.mxu1 }
 0x12a   : > { %v3061_v32 = vpop.f32.mrf.mxu1 }
 0x17a   : > { %v515_v17 = vpop.xlane.xlu0 %514 }
 0x17b   : > { %v517_v18 = vmul.f32 0.032258064, %v515_v17  ;;  %v3904_v17 = vsel %vm758_vm9, 1.0, %v3482_v9 }
 0x17d   : > { %3303 = vrsqrt.f32 %v517_v18  ;;  %vm521_vm2 = vcmp.eq.f32.partialorder %v517_v18, inf  ;;  %v524_v21 = vand.u32 2147483648, %v517_v18  ;;  %vm523_vm3 = vcmp.eq.f32.partialorder %v517_v18, 0.0 }
 0x18a   : > { %v3304_v19 = vpop.eup %3303 }
 0x18b   : > { %v520_v20 = vmul.f32 %v3304_v19, %v517_v18 }
 0x18d   : > { %v522_v22 = vsel %vm521_vm2, %v517_v18, %v520_v20  ;;  %v3909_v20 = vsel %vm737_vm10, 1.0, %v3482_v9  ;;  %vm746_vm2 = vcmp.eq.s32.totalorder %v3828_v45, 5 }
 0x18e   : > { %v525_v23 = vsel %vm523_vm3, %v524_v21, %v522_v22  ;;  %vm770_vm3 = vcmp.eq.s32.totalorder %v3885_v8, 5 }
 0x18f   : > { %v526_v24 = vadd.f32 1e-06, %v525_v23 }
 0x191   : > { %3305 = vrcp.f32 %v526_v24  ;;  %v3914_v24 = vsel %vm761_vm11, 1.0, %v3482_v9 }
 0x19e   : > { %v3306_v25 = vpop.eup %3305 }
 0x19f   : > { %v528_v27 = vmul.f32 %v3306_v25, %v511_v4 }
 0x1a1   : > { %v535_v29 = vmul.f32 %v2925_v26, %v528_v27  ;;  %v3919_v27 = vsel %vm740_vm12, 1.0, %v3482_v9 }
 0x1a3   : > { %v543_v30 = vadd.f32 %v2926_v28, %v535_v29 }
 0x1a5   : > { %3049 = vmatmul.mubr.msk.f32.vlgmr.msra.gmra.mxu0 %vm505_vm0, %v543_v30  ;;  %v3924_v30 = vsel %vm764_vm13, 1.0, %v3482_v9 }
 0x1a6   : > { %3064 = vmatprep.mubr.msk.f32.mxu0 %vm3483_vm1, %v3482_v9  ;;  %3063 = vmatpush3.xpose.msk.msra.mxu0 %vm783_vm4, %v3797_v31 }
 0x1a7   : > { %3072 = vmatprep.subr.mxu0 %v3482_v9 }
 0x265   : > { %v624_v35 = vpop.f32.mrf.mxu0 }
 0x266   : > { %v3810_v37 = vadd.f32 %v2927_v34, %v624_v35 }
 0x267   : > { %v3050_v38 = vpop.f32.mrf.mxu0 }
 0x268   : > { %1032 = vrot.lane.b32.xlu1 %v3810_v37, %s3485_s23  ;;  %v3814_v39 = vadd.f32 %v2931_v36, %v3810_v37  ;;  %v3835_v48 = vadd.f32 %v2930_v46, %v3810_v37  ;;  %v3929_v36 = vsel %vm743_vm14, 1.0, %v3482_v9  ;;  %v3940_v46 = vsel %vm746_vm2, 1.0, %v3482_v9  ;;  %s2989_s23 = sshll.u32 %s3598_s29, 9 }
 0x26a   : > { %3065 = vmatmul.mubr.msk.f32.vlgmr.msra.gmra.mxu0 %vm783_vm4, %v3814_v39 }
 0x26b   : > { %3074 = vmatprep.mubr.msk.f32.mxu0 %vm3483_vm1, %v3482_v9 }
 0x2da   : > { %v1033_v47 = vpop.permute.xlu1 %1032 }
 0x2db   : > { %3073 = vmatpush3.xpose.msk.msra.mxu0 %vm783_vm4, %v1033_v47 }
 0x2dc   : > { %3082 = vmatprep.subr.mxu0 %v3482_v9 }
 0x2de   : > { %3075 = vmatmul.mubr.msk.f32.vlgmr.msra.gmra.mxu0 %vm783_vm4, %v3835_v48 }
 0x2df   : > { %3084 = vmatprep.mubr.msk.f32.mxu0 %vm3483_vm1, %v3482_v9 }
 0x32a   : > { %v856_v51 = vpop.f32.mrf.mxu0 }
 0x32b   : > { %935 = vperm.xlu1 %3241, %v856_v51   ;;  %3068 = vmatpush3.msra.mxu1 %v856_v51 }
 0x32c   : > { %v3066_v52 = vpop.f32.mrf.mxu0  ;;  %3070 = vmatmul.mubr.msk.f32.vlgmr.msra.gmra.mxu1 %vm783_vm4, %v3845_v50  ;;  %3077 = vmatprep.subr.mxu1 %v3482_v9 }
 0x32d   : > { %3079 = vmatprep.mubr.msk.f32.mxu1 %vm3483_vm1, %v3482_v9 }
 0x32f   : > { %3243 = vset.pattern.permute.xlu1 %v3486_v53 }
 0x330   : > { %948 = vperm.xlu1 %3243, %v856_v51  }
 0x334   : > { %3244 = vset.pattern.permute.xlu1 %v3487_v54 }
 0x335   : > { %960 = vperm.xlu1 %3244, %v856_v51  }
 0x339   : > { %3245 = vset.pattern.permute.xlu1 %v3488_v55 }
 0x33a   : > { %972 = vperm.xlu1 %3245, %v856_v51  }
 0x33e   : > { %3246 = vset.pattern.permute.xlu1 %v3489_v56 }
 0x33f   : > { %984 = vperm.xlu1 %3246, %v856_v51  }
 0x343   : > { %3247 = vset.pattern.permute.xlu1 %v3490_v57 }
 0x344   : > { %996 = vperm.xlu1 %3247, %v856_v51  }
 0x348   : > { %3248 = vset.pattern.permute.xlu1 %v3491_v58 }
 0x349   : > { %1008 = vperm.xlu1 %3248, %v856_v51  }
 0x34d   : > { %1203 = vrot.lane.b32.xlu1 %v3797_v31, %s3492_s17 }
 0x34e   : > { %3249 = vset.pattern.permute.xlu1 %v3486_v53 }
 0x39e   : > { %v3861_v59 = vpop.f32.mrf.mxu0 }
 0x3a0   : > { %v3076_v60 = vpop.f32.mrf.mxu0 }
 0x3a6   : > { %v936_v61 = vpop.permute.xlu1 %935 }
 0x3a7   : > { %v938_v15 = vmul.f32 %v3891_v10, %v936_v61  ;;  %v3951_v61 = vsel %vm749_vm5, 1.0, %v3482_v9 }
 0x3ab   : > { %v949_v62 = vpop.permute.xlu1 %948 }
 0x3ac   : > { %v951_v18 = vmul.f32 %v3898_v12, %v949_v62 }
 0x3b0   : > { %v961_v63 = vpop.permute.xlu1 %960 }
 0x3b1   : > { %v963_v25 = vmul.f32 %v3909_v20, %v961_v63 }
 0x3b5   : > { %v973_v0 = vpop.permute.xlu1 %972 }
 0x3b6   : > { %v975_v34 = vmul.f32 %v3919_v27, %v973_v0 }
 0x3ba   : > { %v3863_v1 = vpop.permute.xlu1 %984 }
 0x3bb   : > { %v987_v42 = vmul.f32 %v3929_v36, %v3863_v1 }
 0x3bf   : > { %v3865_v2 = vpop.permute.xlu1 %996 }
 0x3c0   : > { %v999_v52 = vmul.f32 %v3940_v46, %v3865_v2 }
 0x3c4   : > { %v3867_v3 = vpop.permute.xlu1 %1008 }
 0x3c8   : > { %v1204_v4 = vpop.permute.xlu1 %1203 }
 0x3c9   : > { %3083 = vmatpush3.xpose.msk.msra.mxu0 %vm783_vm4, %v1204_v4  ;;  %v3956_v4 = vsel %vm773_vm6, 1.0, %v3482_v9 }
 0x3ca   : > { %3092 = vmatprep.subr.mxu0 %v3482_v9 }
 0x3ec   : > { %v929_v5 = vpop.f32.mrf.mxu1 }
 0x3ed   : > { %954 = vperm.xlu1 %3249, %v929_v5   ;;  %942 = vperm.xlu0 %3242, %v929_v5  }
 0x3ee   : > { %v3071_v6 = vpop.f32.mrf.mxu1 }
 0x3ef   : > { %v3962_v6 = vsel %vm752_vm7, 1.0, %v3482_v9 }
 0x3f1   : > { %3250 = vset.pattern.permute.xlu1 %v3487_v54  ;;  %3255 = vset.pattern.permute.xlu0 %v3491_v58 }
 0x3f2   : > { %966 = vperm.xlu1 %3250, %v929_v5   ;;  %1014 = vperm.xlu0 %3255, %v929_v5  }
 0x3f6   : > { %3251 = vset.pattern.permute.xlu1 %v3488_v55  ;;  %3256 = vset.pattern.permute.xlu0 %v3493_v7 }
 0x3f7   : > { %978 = vperm.xlu1 %3251, %v929_v5   ;;  %1026 = vperm.xlu0 %3256, %v929_v5  }
 0x3fb   : > { %3252 = vset.pattern.permute.xlu1 %v3489_v56  ;;  %3257 = vset.pattern.permute.xlu0 %v3484_v33 }
 0x3fc   : > { %990 = vperm.xlu1 %3252, %v929_v5  }
 0x400   : > { %3253 = vset.pattern.permute.xlu1 %v3490_v57 }
 0x401   : > { %1002 = vperm.xlu1 %3253, %v929_v5   ;;  %v1011_v5 = vmul.f32 %v3951_v61, %v3867_v3 }
 0x405   : > { %3254 = vset.pattern.permute.xlu1 %v3493_v7 }
 0x406   : > { %1020 = vperm.xlu1 %3254, %v856_v51   ;;  %v3945_v51 = vsel %vm770_vm3, 1.0, %v3482_v9 }
 0x40a   : > { %1201 = vrot.lane.b32.xlu1 %v3814_v39, %s3492_s17 }
 0x40b   : > { %3258 = vset.pattern.permute.xlu1 %v3486_v53 }
 0x468   : > { %v955_v13 = vpop.permute.xlu1 %954  ;;  %v943_v14 = vpop.permute.xlu0 %942 }
 0x469   : > { %v945_v16 = vmul.f32 %v3894_v11, %v943_v14  ;;  %v957_v21 = vmul.f32 %v3904_v17, %v955_v13 }
 0x46b   : > { %v946_v19 = vadd.f32 %v945_v16, %v938_v15  ;;  %v3966_v15 = vsel %vm776_vm8, 1.0, %v3482_v9 }
 0x46d   : > { %v952_v22 = vadd.f32 %v951_v18, %v946_v19  ;;  %v967_v23 = vpop.permute.xlu1 %966  ;;  %v1015_v62 = vpop.permute.xlu0 %1014 }
 0x46e   : > { %v969_v29 = vmul.f32 %v3914_v24, %v967_v23  ;;  %v1017_v13 = vmul.f32 %v3956_v4, %v1015_v62  ;;  %v3973_v23 = vld [vmem:[%s451_s21] sm:$0xff]  ;;  %s3495_s21 = smov 64  }
 0x46f   : > { %v958_v26 = vadd.f32 %v957_v21, %v952_v22  ;;  %vm1110_vm9 = vcmp.ne.s32.totalorder %v3973_v23, 0 }
 0x471   : > { %v964_v28 = vadd.f32 %v963_v25, %v958_v26 }
 0x472   : > { %v979_v32 = vpop.permute.xlu1 %978  ;;  %v1027_v16 = vpop.permute.xlu0 %1026 }
 0x473   : > { %v970_v35 = vadd.f32 %v969_v29, %v964_v28  ;;  %v981_v40 = vmul.f32 %v3924_v30, %v979_v32  ;;  %v1029_v3 = vmul.f32 %v3966_v15, %v1027_v16 }
 0x475   : > { %v976_v38 = vadd.f32 %v975_v34, %v970_v35 }
 0x477   : > { %v982_v43 = vadd.f32 %v981_v40, %v976_v38  ;;  %v991_v44 = vpop.permute.xlu1 %990 }
 0x478   : > { %v993_v47 = vmul.f32 %v3934_v41, %v991_v44 }
 0x479   : > { %v988_v49 = vadd.f32 %v987_v42, %v982_v43 }
 0x47b   : > { %v994_v60 = vadd.f32 %v993_v47, %v988_v49 }
 0x47c   : > { %v1003_v63 = vpop.permute.xlu1 %1002 }
 0x47d   : > { %v1000_v0 = vadd.f32 %v999_v52, %v994_v60  ;;  %v1005_v1 = vmul.f32 %v3945_v51, %v1003_v63 }
 0x47f   : > { %v1006_v2 = vadd.f32 %v1005_v1, %v1000_v0 }
 0x481   : > { %v1012_v14 = vadd.f32 %v1011_v5, %v1006_v2  ;;  %v1021_v45 = vpop.permute.xlu1 %1020 }
 0x482   : > { %v1023_v18 = vmul.f32 %v3962_v6, %v1021_v45 }
 0x483   : > { %v1018_v19 = vadd.f32 %v1017_v13, %v1012_v14 }
 0x485   : > { %v1024_v21 = vadd.f32 %v1023_v18, %v1018_v19  ;;  %v1202_v22 = vpop.permute.xlu1 %1201 }
 0x486   : > { %3085 = vmatmul.mubr.msk.f32.vlgmr.msra.gmra.mxu0 %vm783_vm4, %v1202_v22 }
 0x487   : > { %v1030_v8 = vadd.f32 %v1029_v3, %v1024_v21  ;;  %3094 = vmatprep.mubr.msk.f32.mxu0 %vm3483_vm1, %v3482_v9 }
 0x489   : > { %v1106_v25 = vadd.f32 %v3861_v59, %v1030_v8 }
 0x48b   : > { %v1109_v26 = vmul.f32 0.17677669, %v1106_v25 }
 0x48d   : > { %v1111_v28 = vsel %vm1110_vm9, -1e+09, %v1109_v26 }
 0x48e   : > { %v1112_v29 = vsel %vm783_vm4, %v1111_v28, -inf }
 0x48f   : > { %1113 = vmax.xlane.f32.xlu1 %v1112_v29 }
 0x4a0   : > { %1449 = vrot.lane.b32.xlu1 %v3810_v37, %s3494_s0  ;;  %s3500_s0 = smov 104  }
 0x4a4   : > { %1447 = vrot.lane.b32.xlu1 %v3835_v48, %s3492_s17  ;;  %s3499_s17 = smov 48  }
 0x518   : > { %v1114_v32 = vpop.xlane.xlu1 %1113 }
 0x519   : > { %v1115_v34 = vsub.f32 %v1111_v28, %v1114_v32 }
 0x51b   : > { %v1116_v35 = vmul.f32 1.442695, %v1115_v34 }
 0x51c   : > { %v1450_v38 = vpop.permute.xlu1 %1449 }
 0x51d   : > { %3307 = vpow2.f32 %v1116_v35  ;;  %3093 = vmatpush3.xpose.msk.msra.mxu0 %vm783_vm4, %v1450_v38 }
 0x51e   : > { %3102 = vmatprep.subr.mxu0 %v3482_v9 }
 0x520   : > { %v1448_v59 = vpop.permute.xlu1 %1447 }
 0x521   : > { %3095 = vmatmul.mubr.msk.f32.vlgmr.msra.gmra.mxu0 %vm783_vm4, %v1448_v59 }
 0x522   : > { %3104 = vmatprep.mubr.msk.f32.mxu0 %vm3483_vm1, %v3482_v9 }
 0x52a   : > { %v3308_v40 = vpop.eup %3307 }
 0x52b   : > { %v1118_v42 = vsel %vm783_vm4, %v3308_v40, 0.0 }
 0x52c   : > { %1119 = vadd.xlane.f32.xlu0 %v1118_v42 }
 0x542   : > { %1124 = vrot.lane.b32.xlu0 %v3810_v37, %s3495_s21  ;;  %s3501_s21 = smov 72  }
 0x546   : > { %v1275_v43 = vpop.f32.mrf.mxu0 }
 0x547   : > { %1364 = vperm.xlu1 %3258, %v1275_v43   ;;  %1351 = vperm.xlu0 %3257, %v1275_v43  }
 0x548   : > { %v3086_v44 = vpop.f32.mrf.mxu0 }
 0x54b   : > { %3259 = vset.pattern.permute.xlu1 %v3487_v54  ;;  %3260 = vset.pattern.permute.xlu0 %v3488_v55 }
 0x54c   : > { %1376 = vperm.xlu1 %3259, %v1275_v43   ;;  %1388 = vperm.xlu0 %3260, %v1275_v43  }
 0x550   : > { %3261 = vset.pattern.permute.xlu1 %v3484_v33  ;;  %3263 = vset.pattern.permute.xlu0 %v3486_v53 }
 0x5b5   : > { %v1120_v47 = vpop.xlane.xlu0 %1119 }
 0x5b6   : > { %3309 = vrcp.f32 %v1120_v47 }
 0x5b9   : > { %v1125_v49 = vpop.permute.xlu0 %1124 }
 0x5ba   : > { %3078 = vmatpush3.msra.mxu1 %v1125_v49 }
 0x5bb   : > { %3087 = vmatprep.subr.mxu1 %v3482_v9 }
 0x5c2   : > { %v1365_v13 = vpop.permute.xlu1 %1364  ;;  %v1352_v14 = vpop.permute.xlu0 %1351 }
 0x5c3   : > { %v3310_v52 = vpop.eup %3309  ;;  %v1354_v19 = vmul.f32 %v3891_v10, %v1352_v14  ;;  %v1367_v22 = vmul.f32 %v3898_v12, %v1365_v13 }
 0x5c4   : > { %v1122_v60 = vmul.f32 %v3310_v52, %v3308_v40 }
 0x5c6   : > { %1123 = vst.msk [vmem:[%s3998_s27] sm:$0xff] %vm783_vm4, %v1122_v60  ;;  %3080 = vmatmul.mubr.msk.f32.vlgmr.msra.gmra.mxu1 %vm783_vm4, %v1122_v60 }
 0x5c7   : > { %3088 = vmatpush3.msra.mxu1 %v1275_v43  ;;  %3089 = vmatprep.mubr.msk.f32.mxu1 %vm3483_vm1, %v3482_v9  ;;  %v1377_v45 = vpop.permute.xlu1 %1376  ;;  %v1389_v16 = vpop.permute.xlu0 %1388 }
 0x5c8   : > { %3097 = vmatprep.subr.mxu1 %v3482_v9  ;;  %v1379_v32 = vmul.f32 %v3909_v20, %v1377_v45  ;;  %v1391_v59 = vmul.f32 %v3919_v27, %v1389_v16 }
 0x5ca   : > { %3090 = vmatmul.mubr.msk.f32.vlgmr.msra.gmra.mxu1 %vm783_vm4, %v3845_v50 }
 0x5cb   : > { %3099 = vmatprep.mubr.msk.f32.mxu1 %vm3483_vm1, %v3482_v9 }
 0x5e1   : > { %v4010_v62 = vpop.f32.mrf.mxu0 }
 0x5e3   : > { %v3096_v63 = vpop.f32.mrf.mxu0 }
 0x686   : > { %v4012_v0 = vpop.f32.mrf.mxu1 }
 0x688   : > { %v3081_v1 = vpop.f32.mrf.mxu1 }
 0x68a   : > { %v1345_v5 = vpop.f32.mrf.mxu1 }
 0x68b   : > { %1370 = vperm.xlu0 %3263, %v1345_v5   ;;  %1358 = vperm.xlu1 %3261, %v1345_v5  }
 0x68c   : > { %v3091_v2 = vpop.f32.mrf.mxu1 }
 0x68f   : > { %3267 = vset.pattern.permute.xlu0 %v3489_v56  ;;  %3262 = vset.pattern.permute.xlu1 %v3489_v56 }
 0x690   : > { %1406 = vperm.xlu0 %3267, %v1345_v5   ;;  %1400 = vperm.xlu1 %3262, %v1275_v43  }
 0x694   : > { %3268 = vset.pattern.permute.xlu0 %v3491_v58  ;;  %3264 = vset.pattern.permute.xlu1 %v3487_v54 }
 0x695   : > { %1424 = vperm.xlu0 %3268, %v1275_v43   ;;  %1382 = vperm.xlu1 %3264, %v1345_v5  }
 0x699   : > { %3271 = vset.pattern.permute.xlu0 %v3493_v7  ;;  %3265 = vset.pattern.permute.xlu1 %v3488_v55 }
 0x69a   : > { %1442 = vperm.xlu0 %3271, %v1345_v5   ;;  %1394 = vperm.xlu1 %3265, %v1345_v5  }
 0x69e   : > { %3266 = vset.pattern.permute.xlu1 %v3490_v57  ;;  %3274 = vset.pattern.permute.xlu0 %v3487_v54 }
 0x69f   : > { %1412 = vperm.xlu1 %3266, %v1275_v43  }
 0x6a3   : > { %1418 = vperm.xlu1 %3266, %v1345_v5  }
 0x6a7   : > { %3269 = vset.pattern.permute.xlu1 %v3491_v58 }
 0x6a8   : > { %1430 = vperm.xlu1 %3269, %v1345_v5  }
 0x6ac   : > { %3270 = vset.pattern.permute.xlu1 %v3493_v7 }
 0x6ad   : > { %1436 = vperm.xlu1 %3270, %v1275_v43  }
 0x6b1   : > { %3272 = vset.pattern.permute.xlu1 %v3484_v33 }
 0x706   : > { %v1359_v18 = vpop.permute.xlu1 %1358  ;;  %v1371_v21 = vpop.permute.xlu0 %1370 }
 0x707   : > { %v1361_v3 = vmul.f32 %v3894_v11, %v1359_v18  ;;  %v1373_v25 = vmul.f32 %v3904_v17, %v1371_v21 }
 0x709   : > { %v1362_v8 = vadd.f32 %v1361_v3, %v1354_v19 }
 0x70b   : > { %v1368_v26 = vadd.f32 %v1367_v22, %v1362_v8  ;;  %v1401_v28 = vpop.permute.xlu1 %1400  ;;  %v1407_v47 = vpop.permute.xlu0 %1406 }
 0x70c   : > { %v1403_v49 = vmul.f32 %v3929_v36, %v1401_v28  ;;  %v1409_v60 = vmul.f32 %v3934_v41, %v1407_v47 }
 0x70d   : > { %v1374_v29 = vadd.f32 %v1373_v25, %v1368_v26 }
 0x70f   : > { %v1380_v35 = vadd.f32 %v1379_v32, %v1374_v29 }
 0x710   : > { %v1383_v34 = vpop.permute.xlu1 %1382  ;;  %v1425_v16 = vpop.permute.xlu0 %1424 }
 0x711   : > { %v1385_v38 = vmul.f32 %v3914_v24, %v1383_v34  ;;  %v1427_v19 = vmul.f32 %v3951_v61, %v1425_v16 }
 0x713   : > { %v1386_v40 = vadd.f32 %v1385_v38, %v1380_v35 }
 0x715   : > { %v1392_v42 = vadd.f32 %v1391_v59, %v1386_v40  ;;  %v1395_v43 = vpop.permute.xlu1 %1394  ;;  %v1443_v8 = vpop.permute.xlu0 %1442 }
 0x716   : > { %v1397_v44 = vmul.f32 %v3924_v30, %v1395_v43  ;;  %v1445_v29 = vmul.f32 %v3966_v15, %v1443_v8 }
 0x718   : > { %v1398_v52 = vadd.f32 %v1397_v44, %v1392_v42 }
 0x71a   : > { %v1404_v63 = vadd.f32 %v1403_v49, %v1398_v52  ;;  %v1413_v1 = vpop.permute.xlu1 %1412  ;;  %v1616_v52 = vld [vmem:[%s4296_s10 + $0x8] sm:$0xff] }
 0x71b   : > { %v1415_v5 = vmul.f32 %v3940_v46, %v1413_v1  ;;  %3103 = vmatpush3.msra.mxu0 %v1616_v52 }
 0x71c   : > { %v1410_v2 = vadd.f32 %v1409_v60, %v1404_v63  ;;  %3112 = vmatprep.subr.mxu0 %v3482_v9 }
 0x71e   : > { %v1416_v13 = vadd.f32 %v1415_v5, %v1410_v2  ;;  %v1419_v14 = vpop.permute.xlu1 %1418  ;;  %v1200_v5 = vld [vmem:[%s4296_s10] sm:$0xff] }
 0x71f   : > { %v1421_v45 = vmul.f32 %v3945_v51, %v1419_v14 }
 0x721   : > { %v1422_v18 = vadd.f32 %v1421_v45, %v1416_v13 }
 0x723   : > { %v1431_v3 = vpop.permute.xlu1 %1430  ;;  %v1428_v21 = vadd.f32 %v1427_v19, %v1422_v18 }
 0x724   : > { %v1433_v22 = vmul.f32 %v3956_v4, %v1431_v3 }
 0x726   : > { %v1434_v26 = vadd.f32 %v1433_v22, %v1428_v21 }
 0x728   : > { %v1437_v25 = vpop.permute.xlu1 %1436 }
 0x729   : > { %v1439_v28 = vmul.f32 %v3962_v6, %v1437_v25 }
 0x72b   : > { %v1440_v32 = vadd.f32 %v1439_v28, %v1434_v26 }
 0x72d   : > { %v1446_v34 = vadd.f32 %v1445_v29, %v1440_v32 }
 0x72f   : > { %v1522_v35 = vadd.f32 %v4010_v62, %v1446_v34 }
 0x731   : > { %v1525_v38 = vmul.f32 0.17677669, %v1522_v35 }
 0x733   : > { %v1526_v59 = vsel %vm1110_vm9, -1e+09, %v1525_v38 }
 0x734   : > { %v1527_v40 = vsel %vm783_vm4, %v1526_v59, -inf }
 0x735   : > { %1528 = vmax.xlane.f32.xlu1 %v1527_v40 }
 0x746   : > { %1540 = vrot.lane.b32.xlu1 %v3810_v37, %s3496_s24  ;;  %s3503_s24 = smov [#allocation8]  }
 0x74a   : > { %1763 = vrot.lane.b32.xlu1 %v3814_v39, %s3497_s18 }
 0x74e   : > { %2011 = vrot.lane.b32.xlu1 %v3810_v37, %s3498_s19 }
 0x7be   : > { %v1529_v42 = vpop.xlane.xlu1 %1528 }
 0x7bf   : > { %v1530_v43 = vsub.f32 %v1526_v59, %v1529_v42 }
 0x7c1   : > { %v1531_v44 = vmul.f32 1.442695, %v1530_v43 }
 0x7c2   : > { %v1541_v62 = vpop.permute.xlu1 %1540 }
 0x7c3   : > { %3311 = vpow2.f32 %v1531_v44  ;;  %3098 = vmatpush3.msra.mxu1 %v1541_v62 }
 0x7c4   : > { %3107 = vmatprep.subr.mxu1 %v3482_v9 }
 0x7c6   : > { %v1764_v2 = vpop.permute.xlu1 %1763 }
 0x7ca   : > { %v2012_v18 = vpop.permute.xlu1 %2011 }
 0x7d0   : > { %v3312_v47 = vpop.eup %3311 }
 0x7d1   : > { %v1533_v49 = vsel %vm783_vm4, %v3312_v47, 0.0 }
 0x7d2   : > { %1534 = vadd.xlane.f32.xlu0 %v1533_v49 }
 0x7e8   : > { %1765 = vrot.lane.b32.xlu0 %v3797_v31, %s3497_s18 }
 0x7ec   : > { %2009 = vrot.lane.b32.xlu0 %v3835_v48, %s3497_s18  ;;  %s3502_s18 = smov 40  }
 0x85b   : > { %v1535_v60 = vpop.xlane.xlu0 %1534 }
 0x85c   : > { %3313 = vrcp.f32 %v1535_v60 }
 0x85f   : > { %v1766_v14 = vpop.permute.xlu0 %1765 }
 0x863   : > { %v2010_v19 = vpop.permute.xlu0 %2009 }
 0x869   : > { %v3314_v63 = vpop.eup %3313 }
 0x86a   : > { %v1537_v1 = vmul.f32 %v3314_v63, %v3312_v47 }
 0x86c   : > { %2961 = vst.msk [vmem:[%s3998_s27 + $0x8] sm:$0xff] %vm783_vm4, %v1537_v1  ;;  %3100 = vmatmul.mubr.msk.f32.vlgmr.msra.gmra.mxu1 %vm783_vm4, %v1537_v1 }
 0x86d   : > { %3108 = vmatpush3.msra.mxu1 %v1200_v5  ;;  %3109 = vmatprep.mubr.msk.f32.mxu1 %vm3483_vm1, %v3482_v9 }
 0x86e   : > { %3117 = vmatprep.subr.mxu1 %v3482_v9 }
 0x870   : > { %3110 = vmatmul.mubr.msk.f32.vlgmr.msra.gmra.mxu1 %vm783_vm4, %v4012_v0 }
 0x871   : > { %3119 = vmatprep.mubr.msk.f32.mxu1 %vm3483_vm1, %v3482_v9 }
 0x92c   : > { %v1612_v13 = vpop.f32.mrf.mxu1 }
 0x92d   : > { %3105 = vmatmul.mubr.msk.f32.vlgmr.msra.gmra.mxu0 %vm783_vm4, %v1612_v13 }
 0x92e   : > { %3113 = vmatpush3.xpose.msk.msra.mxu0 %vm783_vm4, %v1766_v14  ;;  %v3101_v45 = vpop.f32.mrf.mxu1  ;;  %3114 = vmatprep.mubr.msk.f32.mxu0 %vm3483_vm1, %v3482_v9 }
 0x92f   : > { %3122 = vmatprep.subr.mxu0 %v3482_v9 }
 0x930   : > { %v4074_v16 = vpop.f32.mrf.mxu1 }
 0x931   : > { %3115 = vmatmul.mubr.msk.f32.vlgmr.msra.gmra.mxu0 %vm783_vm4, %v1764_v2 }
 0x932   : > { %3123 = vmatpush3.xpose.msk.msra.mxu0 %vm783_vm4, %v2012_v18  ;;  %v3111_v0 = vpop.f32.mrf.mxu1  ;;  %3124 = vmatprep.mubr.msk.f32.mxu0 %vm3483_vm1, %v3482_v9 }
 0x933   : > { %3132 = vmatprep.subr.mxu0 %v3482_v9 }
 0x935   : > { %3125 = vmatmul.mubr.msk.f32.vlgmr.msra.gmra.mxu0 %vm783_vm4, %v2010_v19 }
 0x936   : > { %3134 = vmatprep.mubr.msk.f32.mxu0 %vm3483_vm1, %v3482_v9 }
 0x9ed   : > { %v4084_v3 = vpop.f32.mrf.mxu0 }
 0x9ef   : > { %v3106_v21 = vpop.f32.mrf.mxu0 }
 0x9f1   : > { %v1837_v22 = vpop.f32.mrf.mxu0 }
 0x9f2   : > { %1938 = vperm.xlu0 %3274, %v1837_v22   ;;  %1913 = vperm.xlu1 %3272, %v1837_v22  }
 0x9f3   : > { %3118 = vmatpush3.msra.mxu1 %v1837_v22  ;;  %v3116_v8 = vpop.f32.mrf.mxu0 }
 0x9f4   : > { %3120 = vmatmul.mubr.msk.f32.vlgmr.msra.gmra.mxu1 %vm783_vm4, %v3845_v50  ;;  %3127 = vmatprep.subr.mxu1 %v3482_v9 }
 0x9f5   : > { %v4089_v25 = vpop.f32.mrf.mxu0  ;;  %3129 = vmatprep.mubr.msk.f32.mxu1 %vm3483_vm1, %v3482_v9 }
 0x9f6   : > { %3273 = vset.pattern.permute.xlu1 %v3486_v53  ;;  %3277 = vset.pattern.permute.xlu0 %v3484_v33 }
 0x9f7   : > { %1926 = vperm.xlu1 %3273, %v1837_v22   ;;  %v3126_v26 = vpop.f32.mrf.mxu0 }
 0x9fb   : > { %3275 = vset.pattern.permute.xlu1 %v3488_v55 }
 0x9fc   : > { %1950 = vperm.xlu1 %3275, %v1837_v22  }
 0xa00   : > { %3276 = vset.pattern.permute.xlu1 %v3489_v56 }
 0xa01   : > { %1962 = vperm.xlu1 %3276, %v1837_v22  }
 0xa05   : > { %3278 = vset.pattern.permute.xlu1 %v3486_v53 }
 0xa6d   : > { %v1914_v32 = vpop.permute.xlu1 %1913  ;;  %v1939_v38 = vpop.permute.xlu0 %1938 }
 0xa6e   : > { %v1916_v43 = vmul.f32 %v3891_v10, %v1914_v32  ;;  %v1941_v63 = vmul.f32 %v3909_v20, %v1939_v38 }
 0xa72   : > { %v1927_v34 = vpop.permute.xlu1 %1926 }
 0xa73   : > { %v1929_v62 = vmul.f32 %v3898_v12, %v1927_v34 }
 0xa77   : > { %v1951_v35 = vpop.permute.xlu1 %1950 }
 0xa78   : > { %v1953_v45 = vmul.f32 %v3919_v27, %v1951_v35 }
 0xa7c   : > { %v1963_v59 = vpop.permute.xlu1 %1962 }
 0xa7d   : > { %v1965_v21 = vmul.f32 %v3929_v36, %v1963_v59 }
 0xab4   : > { %v1907_v28 = vpop.f32.mrf.mxu1 }
 0xab5   : > { %1932 = vperm.xlu1 %3278, %v1907_v28   ;;  %1920 = vperm.xlu0 %3277, %v1907_v28  }
 0xab6   : > { %v3121_v29 = vpop.f32.mrf.mxu1 }
 0xab9   : > { %3279 = vset.pattern.permute.xlu1 %v3487_v54  ;;  %3280 = vset.pattern.permute.xlu0 %v3488_v55 }
 0xaba   : > { %1944 = vperm.xlu1 %3279, %v1907_v28   ;;  %1956 = vperm.xlu0 %3280, %v1907_v28  }
 0xabe   : > { %3282 = vset.pattern.permute.xlu1 %v3491_v58  ;;  %3281 = vset.pattern.permute.xlu0 %v3490_v57 }
 0xabf   : > { %1986 = vperm.xlu1 %3282, %v1837_v22   ;;  %1974 = vperm.xlu0 %3281, %v1837_v22  }
 0xac3   : > { %3283 = vset.pattern.permute.xlu1 %v3489_v56  ;;  %3285 = vset.pattern.permute.xlu0 %v3491_v58 }
 0xac4   : > { %1968 = vperm.xlu1 %3283, %v1907_v28   ;;  %1992 = vperm.xlu0 %3285, %v1907_v28  }
 0xac8   : > { %3284 = vset.pattern.permute.xlu1 %v3490_v57  ;;  %3289 = vset.pattern.permute.xlu0 %v3487_v54 }
 0xac9   : > { %1980 = vperm.xlu1 %3284, %v1907_v28  }
 0xacd   : > { %3286 = vset.pattern.permute.xlu1 %v3493_v7 }
 0xace   : > { %1998 = vperm.xlu1 %3286, %v1837_v22  }
 0xad2   : > { %2004 = vperm.xlu1 %3286, %v1907_v28  }
 0xad6   : > { %3287 = vset.pattern.permute.xlu1 %v3484_v33 }
 0xb30   : > { %v1933_v40 = vpop.permute.xlu1 %1932  ;;  %v1921_v42 = vpop.permute.xlu0 %1920 }
 0xb31   : > { %v1923_v44 = vmul.f32 %v3894_v11, %v1921_v42  ;;  %v1935_v49 = vmul.f32 %v3904_v17, %v1933_v40 }
 0xb33   : > { %v1924_v47 = vadd.f32 %v1923_v44, %v1916_v43 }
 0xb35   : > { %v1930_v52 = vadd.f32 %v1929_v62, %v1924_v47  ;;  %v1945_v60 = vpop.permute.xlu1 %1944  ;;  %v1957_v13 = vpop.permute.xlu0 %1956 }
 0xb36   : > { %v1947_v2 = vmul.f32 %v3914_v24, %v1945_v60  ;;  %v1959_v19 = vmul.f32 %v3924_v30, %v1957_v13 }
 0xb37   : > { %v1936_v1 = vadd.f32 %v1935_v49, %v1930_v52 }
 0xb39   : > { %v1942_v5 = vadd.f32 %v1941_v63, %v1936_v1 }
 0xb3a   : > { %v1987_v14 = vpop.permute.xlu1 %1986  ;;  %v1975_v26 = vpop.permute.xlu0 %1974 }
 0xb3b   : > { %v1948_v18 = vadd.f32 %v1947_v2, %v1942_v5  ;;  %v1977_v32 = vmul.f32 %v3940_v46, %v1975_v26  ;;  %v1989_v43 = vmul.f32 %v3951_v61, %v1987_v14 }
 0xb3d   : > { %v1954_v0 = vadd.f32 %v1953_v45, %v1948_v18 }
 0xb3f   : > { %v1960_v22 = vadd.f32 %v1959_v19, %v1954_v0  ;;  %v1969_v8 = vpop.permute.xlu1 %1968  ;;  %v1993_v35 = vpop.permute.xlu0 %1992 }
 0xb40   : > { %v1971_v28 = vmul.f32 %v3934_v41, %v1969_v8  ;;  %v1995_v62 = vmul.f32 %v3956_v4, %v1993_v35 }
 0xb41   : > { %v1966_v29 = vadd.f32 %v1965_v21, %v1960_v22 }
 0xb43   : > { %v1972_v34 = vadd.f32 %v1971_v28, %v1966_v29 }
 0xb44   : > { %v1981_v38 = vpop.permute.xlu1 %1980 }
 0xb45   : > { %v1978_v40 = vadd.f32 %v1977_v32, %v1972_v34  ;;  %v1983_v42 = vmul.f32 %v3945_v51, %v1981_v38  ;;  %v2178_v32 = vld [vmem:[%s4296_s10 + $0x10] sm:$0xff] }
 0xb46   : > { %3133 = vmatpush3.msra.mxu0 %v2178_v32 }
 0xb47   : > { %v1984_v44 = vadd.f32 %v1983_v42, %v1978_v40  ;;  %3142 = vmatprep.subr.mxu0 %v3482_v9 }
 0xb49   : > { %v1990_v59 = vadd.f32 %v1989_v43, %v1984_v44  ;;  %v1999_v47 = vpop.permute.xlu1 %1998 }
 0xb4a   : > { %v2001_v49 = vmul.f32 %v3962_v6, %v1999_v47 }
 0xb4b   : > { %v1996_v52 = vadd.f32 %v1995_v62, %v1990_v59 }
 0xb4d   : > { %v2002_v60 = vadd.f32 %v2001_v49, %v1996_v52  ;;  %v2005_v63 = vpop.permute.xlu1 %2004 }
 0xb4e   : > { %v2007_v1 = vmul.f32 %v3966_v15, %v2005_v63 }
 0xb50   : > { %v2008_v5 = vadd.f32 %v2007_v1, %v2002_v60 }
 0xb52   : > { %v2084_v2 = vadd.f32 %v4089_v25, %v2008_v5 }
 0xb54   : > { %v2087_v13 = vmul.f32 0.17677669, %v2084_v2 }
 0xb56   : > { %v2088_v45 = vsel %vm1110_vm9, -1e+09, %v2087_v13 }
 0xb57   : > { %v2089_v14 = vsel %vm783_vm4, %v2088_v45, -inf }
 0xb58   : > { %2090 = vmax.xlane.f32.xlu0 %v2089_v14 }
 0xb6e   : > { %2102 = vrot.lane.b32.xlu0 %v3810_v37, %s3499_s17 }
 0xb72   : > { %2253 = vrot.lane.b32.xlu0 %v3814_v39, %s3500_s0 }
 0xb76   : > { %2499 = vrot.lane.b32.xlu0 %v3835_v48, %s3500_s0 }
 0xbe1   : > { %v2091_v18 = vpop.xlane.xlu0 %2090 }
 0xbe2   : > { %v2092_v0 = vsub.f32 %v2088_v45, %v2091_v18 }
 0xbe4   : > { %v2093_v19 = vmul.f32 1.442695, %v2092_v0 }
 0xbe5   : > { %v2103_v25 = vpop.permute.xlu0 %2102 }
 0xbe6   : > { %3315 = vpow2.f32 %v2093_v19  ;;  %3128 = vmatpush3.msra.mxu1 %v2103_v25 }
 0xbe7   : > { %3137 = vmatprep.subr.mxu1 %v3482_v9 }
 0xbe9   : > { %v2254_v28 = vpop.permute.xlu0 %2253 }
 0xbed   : > { %v2500_v29 = vpop.permute.xlu0 %2499 }
 0xbf3   : > { %v3316_v21 = vpop.eup %3315 }
 0xbf4   : > { %v2095_v22 = vsel %vm783_vm4, %v3316_v21, 0.0 }
 0xbf5   : > { %2096 = vadd.xlane.f32.xlu1 %v2095_v22 }
 0xc06   : > { %2255 = vrot.lane.b32.xlu1 %v3797_v31, %s3500_s0  ;;  %s4216_s0 = scalar_lea.hbm %s4299_s13, %s2989_s23 }
 0xc0a   : > { %2501 = vrot.lane.b32.xlu1 %v3810_v37, %s3501_s21  ;;  %s2759_s21 = scalar_lea.sflag [#allocation9], %s3723_s16 }
 0xc7e   : > { %v2097_v39 = vpop.xlane.xlu1 %2096 }
 0xc7f   : > { %3317 = vrcp.f32 %v2097_v39 }
 0xc82   : > { %v2256_v8 = vpop.permute.xlu1 %2255 }
 0xc86   : > { %v2502_v31 = vpop.permute.xlu1 %2501 }
 0xc8c   : > { %v3318_v48 = vpop.eup %3317 }
 0xc8d   : > { %v2099_v26 = vmul.f32 %v3318_v48, %v3316_v21 }
 0xc8f   : > { %2970 = vst.msk [vmem:[%s3998_s27 + $0x10] sm:$0xff] %vm783_vm4, %v2099_v26  ;;  %3130 = vmatmul.mubr.msk.f32.vlgmr.msra.gmra.mxu1 %vm783_vm4, %v2099_v26 }
 0xc90   : > { %3138 = vmatpush3.xpose.msk.msra.mxu1 %vm783_vm4, %v2256_v8  ;;  %3139 = vmatprep.mubr.msk.f32.mxu1 %vm3483_vm1, %v3482_v9 }
 0xc91   : > { %3147 = vmatprep.subr.mxu1 %v3482_v9 }
 0xc93   : > { %3140 = vmatmul.mubr.msk.f32.vlgmr.msra.gmra.mxu1 %vm783_vm4, %v2254_v28 }
 0xc94   : > { %3148 = vmatpush3.xpose.msk.msra.mxu1 %vm783_vm4, %v2502_v31  ;;  %3149 = vmatprep.mubr.msk.f32.mxu1 %vm3483_vm1, %v3482_v9 }
 0xc95   : > { %3157 = vmatprep.subr.mxu1 %v3482_v9 }
 0xc97   : > { %3150 = vmatmul.mubr.msk.f32.vlgmr.msra.gmra.mxu1 %vm783_vm4, %v2500_v29 }
 0xc98   : > { %3159 = vmatprep.mubr.msk.f32.mxu1 %vm3483_vm1, %v3482_v9 }
 0xd4f   : > { %v2174_v34 = vpop.f32.mrf.mxu1 }
 0xd50   : > { %3135 = vmatmul.mubr.msk.f32.vlgmr.msra.gmra.mxu0 %vm783_vm4, %v2174_v34 }
 0xd51   : > { %v3131_v38 = vpop.f32.mrf.mxu1  ;;  %3144 = vmatprep.mubr.msk.f32.mxu0 %vm3483_vm1, %v3482_v9 }
 0xd53   : > { %v2327_v40 = vpop.f32.mrf.mxu1 }
 0xd54   : > { %2428 = vperm.xlu0 %3289, %v2327_v40   ;;  %2403 = vperm.xlu1 %3287, %v2327_v40  }
 0xd55   : > { %3143 = vmatpush3.msra.mxu0 %v2327_v40  ;;  %v3141_v42 = vpop.f32.mrf.mxu1 }
 0xd56   : > { %3145 = vmatmul.mubr.msk.f32.vlgmr.msra.gmra.mxu0 %vm783_vm4, %v3845_v50  ;;  %3152 = vmatprep.subr.mxu0 %v3482_v9  ;;  %v1760_v50 = vadd.f32 %v4074_v16, %v4084_v3 }
 0xd57   : > { %v4160_v35 = vpop.f32.mrf.mxu1  ;;  %3154 = vmatprep.mubr.msk.f32.mxu0 %vm3483_vm1, %v3482_v9 }
 0xd58   : > { %3288 = vset.pattern.permute.xlu1 %v3486_v53  ;;  %3292 = vset.pattern.permute.xlu0 %v3484_v33 }
 0xd59   : > { %2416 = vperm.xlu1 %3288, %v2327_v40   ;;  %v3151_v43 = vpop.f32.mrf.mxu1 }
 0xd5d   : > { %3290 = vset.pattern.permute.xlu1 %v3488_v55 }
 0xd5e   : > { %2440 = vperm.xlu1 %3290, %v2327_v40  }
 0xd62   : > { %3291 = vset.pattern.permute.xlu1 %v3489_v56 }
 0xd63   : > { %2452 = vperm.xlu1 %3291, %v2327_v40  }
 0xd67   : > { %3293 = vset.pattern.permute.xlu1 %v3486_v53 }
 0xdcf   : > { %v2404_v53 = vpop.permute.xlu1 %2403  ;;  %v2429_v16 = vpop.permute.xlu0 %2428 }
 0xdd0   : > { %v2431_v1 = vmul.f32 %v3909_v20, %v2429_v16 }
 0xe10   : > { %v2248_v44 = vpop.f32.mrf.mxu0 }
 0xe11   : > { %v4171_v62 = vadd.f32 %v2248_v44, %v1760_v50 }
 0xe12   : > { %v3136_v9 = vpop.f32.mrf.mxu0 }
 0xe16   : > { %v2397_v59 = vpop.f32.mrf.mxu0 }
 0xe17   : > { %2422 = vperm.xlu1 %3293, %v2397_v59   ;;  %2410 = vperm.xlu0 %3292, %v2397_v59  }
 0xe18   : > { %v3146_v33 = vpop.f32.mrf.mxu0 }
 0xe1b   : > { %3294 = vset.pattern.permute.xlu1 %v3487_v54  ;;  %3295 = vset.pattern.permute.xlu0 %v3488_v55  ;;  %v2417_v54 = vpop.permute.xlu1 %2416 }
 0xe1c   : > { %2434 = vperm.xlu1 %3294, %v2397_v59   ;;  %2446 = vperm.xlu0 %3295, %v2397_v59  }
 0xe1f   : > { %v2441_v55 = vpop.permute.xlu1 %2440 }
 0xe20   : > { %3297 = vset.pattern.permute.xlu1 %v3491_v58  ;;  %3296 = vset.pattern.permute.xlu0 %v3490_v57  ;;  %v2443_v18 = vmul.f32 %v3919_v27, %v2441_v55 }
 0xe21   : > { %2476 = vperm.xlu1 %3297, %v2327_v40   ;;  %2464 = vperm.xlu0 %3296, %v2327_v40  }
 0xe23   : > { %v2453_v3 = vpop.permute.xlu1 %2452 }
 0xe25   : > { %3298 = vset.pattern.permute.xlu1 %v3489_v56  ;;  %3300 = vset.pattern.permute.xlu0 %v3491_v58  ;;  %v2406_v58 = vmul.f32 %v3891_v10, %v2404_v53 }
 0xe26   : > { %2458 = vperm.xlu1 %3298, %v2397_v59   ;;  %2482 = vperm.xlu0 %3300, %v2397_v59  }
 0xe2a   : > { %3299 = vset.pattern.permute.xlu1 %v3490_v57  ;;  %3302 = vset.pattern.permute.xlu0 %v3493_v7  ;;  %v2419_v57 = vmul.f32 %v3898_v12, %v2417_v54  ;;  %v2455_v12 = vmul.f32 %v3929_v36, %v2453_v3 }
 0xe2b   : > { %2470 = vperm.xlu1 %3299, %v2397_v59  }
 0xe2f   : > { %3301 = vset.pattern.permute.xlu1 %v3493_v7 }
 0xe30   : > { %2488 = vperm.xlu1 %3301, %v2327_v40  }
 0xe34   : > { %2494 = vperm.xlu1 %3301, %v2397_v59  }
 0xe92   : > { %v2411_v47 = vpop.permute.xlu0 %2410  ;;  %v2423_v56 = vpop.permute.xlu1 %2422 }
 0xe93   : > { %v2413_v49 = vmul.f32 %v3894_v11, %v2411_v47  ;;  %v2425_v63 = vmul.f32 %v3904_v17, %v2423_v56 }
 0xe95   : > { %v2414_v52 = vadd.f32 %v2413_v49, %v2406_v58 }
 0xe97   : > { %v2420_v60 = vadd.f32 %v2419_v57, %v2414_v52  ;;  %v2435_v7 = vpop.permute.xlu1 %2434  ;;  %v2447_v45 = vpop.permute.xlu0 %2446 }
 0xe98   : > { %v2437_v13 = vmul.f32 %v3914_v24, %v2435_v7  ;;  %v2449_v11 = vmul.f32 %v3924_v30, %v2447_v45 }
 0xe99   : > { %v2426_v5 = vadd.f32 %v2425_v63, %v2420_v60 }
 0xe9b   : > { %v2432_v2 = vadd.f32 %v2431_v1, %v2426_v5 }
 0xe9c   : > { %v2477_v14 = vpop.permute.xlu1 %2476  ;;  %v2465_v17 = vpop.permute.xlu0 %2464 }
 0xe9d   : > { %v2438_v10 = vadd.f32 %v2437_v13, %v2432_v2  ;;  %v2467_v22 = vmul.f32 %v3940_v46, %v2465_v17  ;;  %v2479_v26 = vmul.f32 %v3951_v61, %v2477_v14 }
 0xe9f   : > { %v2444_v0 = vadd.f32 %v2443_v18, %v2438_v10 }
 0xea1   : > { %v2450_v19 = vadd.f32 %v2449_v11, %v2444_v0  ;;  %v2459_v25 = vpop.permute.xlu1 %2458  ;;  %v2483_v27 = vpop.permute.xlu0 %2482 }
 0xea2   : > { %v2461_v21 = vmul.f32 %v3934_v41, %v2459_v25  ;;  %v2485_v30 = vmul.f32 %v3956_v4, %v2483_v27 }
 0xea3   : > { %v2456_v20 = vadd.f32 %v2455_v12, %v2450_v19 }
 0xea5   : > { %v2462_v39 = vadd.f32 %v2461_v21, %v2456_v20 }
 0xea6   : > { %v2471_v24 = vpop.permute.xlu1 %2470 }
 0xea7   : > { %v2468_v48 = vadd.f32 %v2467_v22, %v2462_v39  ;;  %v2473_v8 = vmul.f32 %v3945_v51, %v2471_v24 }
 0xea9   : > { %v2474_v28 = vadd.f32 %v2473_v8, %v2468_v48 }
 0xeab   : > { %v2480_v36 = vadd.f32 %v2479_v26, %v2474_v28  ;;  %v2489_v31 = vpop.permute.xlu1 %2488 }
 0xeac   : > { %v2491_v29 = vmul.f32 %v3962_v6, %v2489_v31 }
 0xead   : > { %v2486_v32 = vadd.f32 %v2485_v30, %v2480_v36 }
 0xeaf   : > { %v2492_v41 = vadd.f32 %v2491_v29, %v2486_v32  ;;  %v2495_v34 = vpop.permute.xlu1 %2494 }
 0xeb0   : > { %v2497_v46 = vmul.f32 %v3966_v15, %v2495_v34 }
 0xeb2   : > { %v2498_v38 = vadd.f32 %v2497_v46, %v2492_v41 }
 0xeb4   : > { %v2574_v40 = vadd.f32 %v4160_v35, %v2498_v38 }
 0xeb6   : > { %v2577_v42 = vmul.f32 0.17677669, %v2574_v40 }
 0xeb8   : > { %v2578_v51 = vsel %vm1110_vm9, -1e+09, %v2577_v42 }
 0xeb9   : > { %v2579_v61 = vsel %vm783_vm4, %v2578_v51, -inf }
 0xeba   : > { %2580 = vmax.xlane.f32.xlu0 %v2579_v61 }
 0xed0   : > { %2592 = vrot.lane.b32.xlu0 %v3810_v37, %s3502_s18  ;;  %v2668_v37 = vld [vmem:[%s4296_s10 + $0x18] sm:$0xff]  ;;  %s3384_s18 = sshll.u32 %s3503_s24, 4  ;;  %s3385_s18 = int_to_ptr.vmem [resolvable:$false] %s3384_s18 }
 0xed1   : > { %3158 = vmatpush3.msra.mxu1 %v2668_v37  ;;  %p3387_p10 = scmp.lt.s32.totalorder %s4218_s30, %s3385_s18 }
 0xf43   : > { %v2581_v4 = vpop.xlane.xlu0 %2580 }
 0xf44   : > { %v2582_v6 = vsub.f32 %v2578_v51, %v2581_v4 }
 0xf46   : > { %v2583_v43 = vmul.f32 1.442695, %v2582_v6 }
 0xf47   : > { %v2593_v50 = vpop.permute.xlu0 %2592 }
 0xf48   : > { %3319 = vpow2.f32 %v2583_v43  ;;  %3153 = vmatpush3.msra.mxu0 %v2593_v50 }
 0xf55   : > { %v3320_v15 = vpop.eup %3319 }
 0xf56   : > { %v2585_v35 = vsel %vm783_vm4, %v3320_v15, 0.0 }
 0xf57   : > { %2586 = vadd.xlane.f32.xlu1 %v2585_v35 }
 0xfe0   : > { %v2587_v23 = vpop.xlane.xlu1 %2586 }
 0xfe1   : > { %3321 = vrcp.f32 %v2587_v23 }
 0xfee   : > { %v3322_v44 = vpop.eup %3321 }
 0xfef   : > { %v2589_v9 = vmul.f32 %v3322_v44, %v3320_v15 }
 0xff1   : > { %2978 = vst.msk [vmem:[%s3998_s27 + $0x18] sm:$0xff] %vm783_vm4, %v2589_v9  ;;  %3155 = vmatmul.mubr.msk.f32.vlgmr.msra.gmra.mxu0 %vm783_vm4, %v2589_v9  ;;  %s3386_s27 = scalar_lea.vmem %s3385_s18, 1024 }
 0xff2   : > { %p3388_p2 = scmp.lt.s32.totalorder %s3386_s27, %s3380_s25 }
 0xff4   : > { %p3389_p4 = por %p3388_p2, %p3387_p10 }
 0xff6   : > { %p3390_p5 = pnand %p3389_p4, %p3383_p8 }
0x10b1   : > { %v2664_v59 = vpop.f32.mrf.mxu0 }
0x10b2   : > { %3160 = vmatmul.mubr.msk.f32.vlgmr.msra.gmra.mxu1 %vm783_vm4, %v2664_v59 }
0x10b3   : > { %v3156_v33 = vpop.f32.mrf.mxu0 }
0x10b4   : > { %3393 = shalt.err (!%p3390_p5)
}
0x10b5   : > { %s3394_s19 = scalar_lea.hbm %s4216_s0, 512  ;;  %s3398_s22 = scalar_lea.hbm %s4299_s13, 1024 }
0x10b6   : > { %p3395_p9 = scmp.ne.s32.totalorder %s4216_s0, %s3394_s19  ;;  %p3399_p12 = scmp.lt.s32.totalorder %s4216_s0, %s4299_s13 }
0x10b7   : > { %p3400_p1 = scmp.lt.s32.totalorder %s3398_s22, %s3394_s19 }
0x10b8   : > { %p3396_p0 = pnand %p3395_p9, %p4332_p3 }
0x10b9   : > { %p3401_p6 = por %p3400_p1, %p3399_p12 }
0x10ba   : > { %p3397_p11 = pneg %p3396_p0 }
0x10bc   : > { %p3402_p13 = pnand %p3401_p6, %p3397_p11 }
0x10be   : > { %3405 = shalt.err (!%p3402_p13)
}
0x10bf   : > { %s3504_s25 = smov 128   ;;  %s3505_s18 = smov 8   ;;  %v2981_v54 = vld [vmem:[%s4297_s11] ss:$0 sm:$0xff] }
0x10c0   : > { %3167 = dma.vmem_to_hbm [thread:$0]  (%p4332_p3), %s4218_s30, 512, %s4216_s0, %s2759_s21, %s3504_s25, %s3504_s25, %s3505_s18  }
0x10c1   : > { %s2984_s19 = sshll.u32 %s3598_s29, 7  ;;  %s496_s23 = scalar_lea.vmem [#allocation7], %s3726_s15  ;;  %v3323_v47 = vld [vmem:[%s442_s12] sm:$0xff] }
0x10c2   : > { %s2772_s22 = sshll.u32 %s496_s23, 4  ;;  %s4333_s1 = sld [smem:[#allocation21_spill]]  ;;  %s2773_s22 = int_to_ptr.vmem [resolvable:$true] %s2772_s22 }
0x10c3   : > { %s2754_s0 = scalar_lea.sflag [#allocation4], %s3723_s16  ;;  %s3406_s21 = scalar_lea.vmem %s2773_s22, 128 }
0x10c4   : > { %p3407_p7 = scmp.ne.s32.totalorder %s2773_s22, %s3406_s21  ;;  %s3506_s29 = smov [#allocation7]  }
0x10c5   : > { %s3410_s25 = sshll.u32 %s3506_s29, 4  ;;  %s3411_s25 = int_to_ptr.vmem [resolvable:$false] %s3410_s25 }
0x10c6   : > { %p3408_p8 = pnand %p3407_p7, %p4332_p3  ;;  %s3412_s18 = scalar_lea.vmem %s3411_s25, 256 }
0x10c7   : > { %p3413_p2 = scmp.lt.s32.totalorder %s2773_s22, %s3411_s25  ;;  %p3414_p4 = scmp.lt.s32.totalorder %s3412_s18, %s3406_s21 }
0x10c8   : > { %s2770_s30 = scalar_lea.hbm %s4333_s1, %s2984_s19  ;;  %p3409_p10 = pneg %p3408_p8 }
0x10c9   : > { %p3415_p5 = por %p3414_p4, %p3413_p2 }
0x10cb   : > { %p3416_p9 = pnand %p3415_p5, %p3409_p10 }
0x1172   : > { %v2738_v53 = vpop.f32.mrf.mxu1 }
0x1173   : > { %v2742_v55 = vadd.f32 %v2738_v53, %v4171_v62 }
0x1174   : > { %v3161_v16 = vpop.f32.mrf.mxu1 }
0x1175   : > { %v2750_v3 = vadd.f32 %v2981_v54, %v2742_v55 }
0x1177   : > { %v2751_v56 = vadd.f32 %v3323_v47, %v2750_v3 }
0x1179   : > { %2752 = vst.msk [vmem:[%s496_s23] sm:$0xff] %vm505_vm0, %v2751_v56 }
0x117a   : > { %3419 = shalt.err (!%p3416_p9)
}
0x117b   : > { %s3420_s15 = scalar_lea.hbm %s2770_s30, 128  ;;  %s3424_s27 = scalar_lea.hbm %s4333_s1, 256 }
0x117c   : > { %p3421_p0 = scmp.ne.s32.totalorder %s2770_s30, %s3420_s15  ;;  %p3425_p1 = scmp.lt.s32.totalorder %s2770_s30, %s4333_s1 }
0x117d   : > { %p3426_p6 = scmp.lt.s32.totalorder %s3424_s27, %s3420_s15 }
0x117e   : > { %p3422_p11 = pnand %p3421_p0, %p4332_p3 }
0x117f   : > { %p3427_p13 = por %p3426_p6, %p3425_p1 }
0x1180   : > { %p3423_p12 = pneg %p3422_p11 }
0x1182   : > { %p3428_p7 = pnand %p3427_p13, %p3423_p12 }
0x1184   : > { %3431 = shalt.err (!%p3428_p7)
}
0x1185   : > { %3166 = dma.vmem_to_hbm [thread:$0]  (%p4332_p3), %s2773_s22, 128, %s2770_s30, %s2754_s0  }
0x1186 PF: > { %s4334_s23 = sld [smem:[#allocation14_spill]]  ;;  %p4337_p10 = scmp.ge.s32.totalorder %s3478_s28, 2 }
0x1187   : > { %s4335_s17 = sld [smem:[#allocation18_spill]] }
0x118c   : > { %s2800_s24 = sand.u32 1, %s4334_s23  }
0x118d   : > { %p4336_p8 = scmp.ne.s32.totalorder %s4335_s17, 0  ;;  %s2801_s21 = scalar_lea.sflag [#allocation4], %s2800_s24 }
0x118f   : > { %p3178_p2 = pnand %p4337_p10, %p4336_p8 }
0x1191   : > { %p3179_p4 = pneg %p3178_p2 }
0x1193   : > { %3457 = dma.done.wait (%p3179_p4), %s2801_s21, 128  }
0x1194   : > { %3459 = vsyncadd (%p3179_p4), %s2801_s21, 4294967168  ;;  %s2810_s29 = scalar_lea.sflag [#allocation9], %s2800_s24 }
0x1195   : > { %3461 = dma.done.wait (%p3179_p4), %s2810_s29, 512  }
0x1196   : > { %3463 = vsyncadd (%p3179_p4), %s2810_s29, 4294966784  ;;  %s4338_s28 = sld [smem:[#allocation16_spill]]  ;;  %s4341_s25 = smov %s3470_s26 }
0x1197   : > { %s4339_s18 = sld [smem:[#allocation15_spill]] }
0x1198   : > { %s4340_s27 = sld [smem:[#allocation17_spill]] }
0x119c   : > { %p33_p3 = scmp.ge.s32.totalorder %s4338_s28, 4  }
0x119d   : > { %s4342_s26 = smov %s4339_s18 }
0x119e   :  { %35 = sbr.rel (!%p33_p3) target bundleno = 13 (0xd), region = 146 }
0x11a3   :  { %2815 = vsyncpa [#allocation3], 1 }
0x11a4   :  { %2817 = vsyncpa [#allocation3 + $0x1], 1 }
0x11a5   :  { %2818 = vsyncpa [#allocation6], 1 }
0x11a6   :  { %2820 = vsyncpa [#allocation6 + $0x1], 1 }
0x11a7   :  { %2821 = vsyncpa [#allocation4], 1 }
0x11a8   :  { %2823 = vsyncpa [#allocation4 + $0x1], 1 }
0x11a9   :  { %2824 = vsyncpa [#allocation9], 1 }
0x11aa   :  { %2826 = vsyncpa [#allocation9 + $0x1], 1 }

</bundles_post_ra>
